<compile_context>
chip_gen: v5e
topology: v5e:2x2
jax: 0.10.0
libtpu: 0.0.40
codegen_flags: <defaults>
</compile_context>

<pallas_src>
import functools
import numpy as np
import jax
import jax.numpy as jnp
from jax import lax
from jax.experimental import pallas as pl
from jax.experimental.pallas import tpu as pltpu

H = 128  # hidden width == lane width


# ----------------------------- Pallas kernel ------------------------------ #
def simplenet2_kernel(x_ref, abd_ref, at_ref, ready_ref, w_ref, b_ref, out_ref,
                      *, g, n, npad, d):
    f32 = jnp.float32
    bf16 = jnp.bfloat16

    # ---- resident weight / bias slabs (constant index_map -> stay in VMEM) ----
    w_s1 = w_ref[0:d, :]                      # [D,128]   conv_succ1 weight (bf16)
    w_l1 = w_ref[d:d + H, :]                  # [128,128] linear1
    w_l2 = w_ref[d + H:d + 2 * H, :]          # [128,128] linear2
    w_hd = w_ref[d + 2 * H:d + 3 * H, :]      # [128,128] lanes 0/1/2 = w_probs/w_value/w_dn
    b_s1 = b_ref[0:1, :]                      # [1,128]  f32
    b_l1 = b_ref[1:2, :]
    b_l2 = b_ref[2:3, :]
    b_misc = b_ref[3:4, :]                    # lanes 0/1/2 = b_probs/b_value/b_dn
    b_probs = b_misc[:, 0:1]                  # [1,1]
    b_value = b_misc[:, 1:2]
    b_dn = b_misc[:, 2:3]

    # ---- per-step inputs (G graphs stacked along sublanes) ----
    x = x_ref[...]                            # [M, D]  bf16, M = G*NPAD
    a_bd = abd_ref[...]                       # [M, M]  bf16 block-diagonal A_hat
    aT = at_ref[...]                          # [NPAD,128] f32 A_hat^T (rows/lanes >= n zero)
    ready = ready_ref[...]                    # [G, 128] f32 ready masks

    # conv_succ1 (A_hat @ X @ W + b) -> relu -> linear1 -> relu -> linear2 -> relu
    # bf16 MXU operands, f32 accumulation + elementwise.
    xw = jnp.dot(x, w_s1, preferred_element_type=f32)                        # [M,128]
    h = jnp.dot(a_bd, xw.astype(bf16), preferred_element_type=f32) + b_s1
    h = jnp.maximum(h, 0.0)
    h = jnp.maximum(jnp.dot(h.astype(bf16), w_l1, preferred_element_type=f32) + b_l1, 0.0)
    h = jnp.maximum(jnp.dot(h.astype(bf16), w_l2, preferred_element_type=f32) + b_l2, 0.0)

    # fused heads: one full-width MXU pass covers conv_probs / value / do-nothing
    head = jnp.dot(h.astype(bf16), w_hd, preferred_element_type=f32)         # [M,128]

    # mask padded node rows (node index within graph >= n) and split per graph
    row_valid = (lax.broadcasted_iota(jnp.int32, (npad, H), 0) < n).astype(f32)
    head_g = head.reshape(g, npad, H) * row_valid.reshape(1, npad, H)        # [G,NPAD,128]

    # per-graph column means (mean commutes with the head matmul); divide by n, not npad
    col_mean = jnp.sum(head_g, axis=1) * f32(1.0 / n)                        # [G,128]
    v = col_mean[:, 1:2] + b_value                                           # [G,1] value head
    pn = col_mean[:, 2:3] + b_dn                                             # [G,1] do-nothing logit

    # conv_probs adjacency: node_logits[g,i] = sum_j A[i,j]*pre[g,j]
    # segmented VPU multiply + XLU sublane reduce -> lane-dense [G,128]; MXU stays free.
    pre = head_g[:, :, 0:1]                                                  # [G,NPAD,1]
    node_logits = jnp.sum(aT.reshape(1, npad, H) * pre, axis=1) + b_probs    # [G,128]

    # masked softmax per graph over {ready node logits} U {do-nothing logit}
    lane = lax.broadcasted_iota(jnp.int32, (g, H), 1)
    is_node = lane < n
    is_dn = lane == n
    valid = jnp.logical_or(jnp.logical_and(is_node, ready > 0.5), is_dn)
    logits = jnp.where(is_dn, pn, node_logits)            # do-nothing logit into lane n
    logits = jnp.where(valid, logits, f32(-1e30))
    m = jnp.max(logits, axis=1, keepdims=True)            # [G,1]
    e = jnp.where(valid, jnp.exp(logits - m), 0.0)
    denom = jnp.sum(e, axis=1, keepdims=True)
    probs = e * pl.reciprocal(denom, approx=False)        # exact: keep |sum-1| < 1e-5

    # lanes 0..n-1: node probs (0 if not ready), lane n: p(do nothing), lane n+1: value
    out_ref[...] = jnp.where(lane == n + 1, v, probs)


# ------------------------------ JAX wrapper -------------------------------- #
def simplenet2_forward(x_slab, abd, at, ready_slab, w_slab, b_slab,
                       *, B, g, n, npad, d):
    assert n + 1 < H, "output packing needs free lanes n (do-nothing) and n+1 (value)"
    assert B % g == 0 and g % 8 == 0 and npad % 8 == 0 and n <= npad
    M = g * npad
    assert x_slab.shape == (B * npad, d) and abd.shape == (M, M)
    kernel = functools.partial(simplenet2_kernel, g=g, n=n, npad=npad, d=d)
    out = pl.pallas_call(
        kernel,
        grid=(B // g,),
        in_specs=[
            pl.BlockSpec((M, d), lambda b: (b, 0)),          # G graphs' node features / step
            pl.BlockSpec((M, M), lambda b: (0, 0)),          # block-diag A_hat: VMEM-resident
            pl.BlockSpec((npad, H), lambda b: (0, 0)),       # A_hat^T: VMEM-resident
            pl.BlockSpec((g, H), lambda b: (b, 0)),          # per-graph ready masks
            pl.BlockSpec(w_slab.shape, lambda b: (0, 0)),    # weights: VMEM-resident
            pl.BlockSpec(b_slab.shape, lambda b: (0, 0)),    # biases: VMEM-resident
        ],
        out_specs=pl.BlockSpec((g, H), lambda b: (b, 0)),    # sublane-dense [G,128] output
        out_shape=jax.ShapeDtypeStruct((B, H), jnp.float32),
        compiler_params=pltpu.CompilerParams(
            dimension_semantics=("parallel",)),              # >=2 steps feed both v7x TCs
    )(x_slab, abd, at, ready_slab, w_slab, b_slab)
    return out   # [B, 128]


# --------------------------- host-side packing ----------------------------- #
def gcn_norm_dense_t2s(edge_index, num_nodes):
    """Dense normalized adjacency for GCNConv(flow='target_to_source'),
    with self-loops and symmetric normalization (matches PyG's gcn_norm)."""
    src = np.concatenate([edge_index[0], np.arange(num_nodes)])
    dst = np.concatenate([edge_index[1], np.arange(num_nodes)])
    w = np.ones(src.shape[0], np.float32)
    deg = np.zeros(num_nodes, np.float32)
    np.add.at(deg, src, w)
    dis = np.where(deg > 0, 1.0 / np.sqrt(deg), 0.0).astype(np.float32)
    norm = dis[src] * w * dis[dst]
    A = np.zeros((num_nodes, num_nodes), np.float32)
    np.add.at(A, (src, dst), norm)
    return A


def init_params(key, input_dim, hidden=H):
    ks = jax.random.split(key, 12)

    def glorot(k, shape):
        fan_in, fan_out = shape[0], shape[1]
        lim = np.sqrt(6.0 / (fan_in + fan_out))
        return jax.random.uniform(k, shape, jnp.float32, -lim, lim)

    return {
        # weights stored already transposed: [in, out]
        "w_succ1": glorot(ks[0], (input_dim, hidden)),
        "b_succ1": jnp.zeros((1, hidden), jnp.float32),
        "w_l1": glorot(ks[1], (hidden, hidden)),
        "b_l1": jax.random.uniform(ks[2], (1, hidden), jnp.float32, -0.05, 0.05),
        "w_l2": glorot(ks[3], (hidden, hidden)),
        "b_l2": jax.random.uniform(ks[4], (1, hidden), jnp.float32, -0.05, 0.05),
        "w_probs": glorot(ks[5], (hidden, 1)),
        "b_probs": jnp.zeros((1, 1), jnp.float32),
        "w_value": glorot(ks[6], (hidden, 1)),
        "b_value": jax.random.uniform(ks[7], (1, 1), jnp.float32, -0.05, 0.05),
        "w_dn": glorot(ks[8], (hidden, 1)),
        "b_dn": jax.random.uniform(ks[9], (1, 1), jnp.float32, -0.05, 0.05),
    }


def pack_weight_slab(params, input_dim, hidden=H):
    d = input_dim
    w = np.zeros((d + 3 * hidden, hidden), np.float32)
    w[0:d, :] = np.asarray(params["w_succ1"])
    w[d:d + hidden, :] = np.asarray(params["w_l1"])
    w[d + hidden:d + 2 * hidden, :] = np.asarray(params["w_l2"])
    heads = np.zeros((hidden, hidden), np.float32)
    heads[:, 0] = np.asarray(params["w_probs"])[:, 0]
    heads[:, 1] = np.asarray(params["w_value"])[:, 0]
    heads[:, 2] = np.asarray(params["w_dn"])[:, 0]
    w[d + 2 * hidden:d + 3 * hidden, :] = heads
    return jnp.asarray(w, jnp.bfloat16)           # MXU operands in bf16


def pack_bias_slab(params, hidden=H):
    b = np.zeros((8, hidden), np.float32)
    b[0, :] = np.asarray(params["b_succ1"])[0]
    b[1, :] = np.asarray(params["b_l1"])[0]
    b[2, :] = np.asarray(params["b_l2"])[0]
    b[3, 0] = float(params["b_probs"][0, 0])
    b[3, 1] = float(params["b_value"][0, 0])
    b[3, 2] = float(params["b_dn"][0, 0])
    return jnp.asarray(b)                          # bias math stays f32


def pack_x_slab(x_b, npad):
    B, n, d = x_b.shape
    slab = np.zeros((B, npad, d), np.float32)
    slab[:, :n, :] = np.asarray(x_b)
    return jnp.asarray(slab.reshape(B * npad, d), jnp.bfloat16)


def pack_block_diag_adj(a_hat, g, npad):
    n = a_hat.shape[0]
    M = g * npad
    a_bd = np.zeros((M, M), np.float32)
    for i in range(g):
        a_bd[i * npad:i * npad + n, i * npad:i * npad + n] = a_hat
    return jnp.asarray(a_bd, jnp.bfloat16)


def pack_adj_t(a_hat, npad, hidden=H):
    n = a_hat.shape[0]
    at = np.zeros((npad, hidden), np.float32)
    at[0:n, 0:n] = a_hat.T
    return jnp.asarray(at)


def pack_ready_slab(ready_b, hidden=H):
    B, n = ready_b.shape
    slab = np.zeros((B, hidden), np.float32)
    slab[:, :n] = ready_b
    return jnp.asarray(slab)


# ------------------------- numpy reference (check) ------------------------- #
def ref_forward(x, a_hat, p, ready):
    h = np.maximum(a_hat @ (x @ np.asarray(p["w_succ1"])) + np.asarray(p["b_succ1"]), 0.0)
    h = np.maximum(h @ np.asarray(p["w_l1"]) + np.asarray(p["b_l1"]), 0.0)
    h = np.maximum(h @ np.asarray(p["w_l2"]) + np.asarray(p["b_l2"]), 0.0)
    logits = a_hat @ (h @ np.asarray(p["w_probs"])) + np.asarray(p["b_probs"])  # [N,1]
    x_mean = h.mean(axis=0)
    v = float(x_mean @ np.asarray(p["w_value"])[:, 0] + float(p["b_value"][0, 0]))
    pn = float(x_mean @ np.asarray(p["w_dn"])[:, 0] + float(p["b_dn"][0, 0]))
    sel = logits[ready.astype(bool), 0]
    cat = np.concatenate([sel, [pn]])
    cat = cat - cat.max()
    e = np.exp(cat)
    return e / e.sum(), v


# ----------------------------------- main ----------------------------------- #
if __name__ == "__main__":
    key = jax.random.PRNGKey(0)
    k_x, k_p, k_r = jax.random.split(key, 3)

    B = 32           # batch of independent graphs
    G = 16           # graphs per grid step -> M = G*NPAD = 128 MXU rows, grid=(2,)
    N = 8            # nodes per graph
    NPAD = 8         # node count rounded to sublane multiple
    INPUT_DIM = 32   # node feature dim

    # deterministic small graph (directed edges), shared topology across the batch
    edge_index = np.array(
        [[0, 1, 2, 3, 4, 5, 6, 0, 2, 4],
         [1, 2, 3, 4, 5, 6, 7, 3, 5, 7]], dtype=np.int32)

    a_hat = gcn_norm_dense_t2s(edge_index, N)            # np [N,N]
    params = init_params(k_p, INPUT_DIM)

    x_b = jax.random.normal(k_x, (B, N, INPUT_DIM), jnp.float32)
    ready_b = np.array(jax.random.uniform(k_r, (B, N)) > 0.4, dtype=np.float32)
    ready_b[:, 0] = 1.0                                  # ensure non-empty ready set per graph

    x_slab = pack_x_slab(np.asarray(x_b), NPAD)          # [B*NPAD, D]  bf16
    abd = pack_block_diag_adj(a_hat, G, NPAD)            # [G*NPAD, G*NPAD] bf16 (resident)
    at = pack_adj_t(a_hat, NPAD)                         # [NPAD, 128] f32 (resident)
    ready_slab = pack_ready_slab(ready_b)                # [B, 128] f32
    w_slab = pack_weight_slab(params, INPUT_DIM)         # [D+3*128, 128] bf16 (resident)
    b_slab = pack_bias_slab(params)                      # [8, 128] f32 (resident)

    out = simplenet2_forward(x_slab, abd, at, ready_slab, w_slab, b_slab,
                             B=B, g=G, n=N, npad=NPAD, d=INPUT_DIM)
    out = jax.block_until_ready(out)

    out_np = np.asarray(out)          # [B, 128]
    probs_nodes = out_np[:, :N]       # per-node softmax probs (0 for non-ready nodes)
    p_nothing = out_np[:, N]          # prob("do nothing")
    values = out_np[:, N + 1]         # value head

    x_np = np.asarray(x_b)
    for b in range(B):
        rb = ready_b[b].astype(bool)
        # final ragged assembly: cat(probs[ready].squeeze(-1), prob_nothing), like the module
        final_probs = np.concatenate([probs_nodes[b, rb], [p_nothing[b]]])
        assert final_probs.shape == (int(rb.sum()) + 1,)
        assert np.isfinite(final_probs).all()
        assert abs(float(final_probs.sum()) - 1.0) < 1e-5
        ref_p, ref_v = ref_forward(x_np[b], a_hat, params, ready_b[b])
        assert np.allclose(final_probs, ref_p, atol=5e-2), (b, final_probs, ref_p)
        assert abs(float(values[b]) - ref_v) < 5e-2 + 1e-2 * abs(ref_v), (b, values[b], ref_v)

    print("KERNEL_OK")
</pallas_src>

<mosaic_0001>
module attributes {stable_mosaic.version = 11 : i64} {
  func.func @simplenet2_kernel(%arg0: i32, %arg1: memref<128x32xbf16, #tpu.memory_space<vmem>>, %arg2: memref<128x128xbf16, #tpu.memory_space<vmem>>, %arg3: memref<8x128xf32, #tpu.memory_space<vmem>>, %arg4: memref<16x128xf32, #tpu.memory_space<vmem>>, %arg5: memref<416x128xbf16, #tpu.memory_space<vmem>>, %arg6: memref<8x128xf32, #tpu.memory_space<vmem>>, %arg7: memref<16x128xf32, #tpu.memory_space<vmem>>) attributes {dimension_semantics = [#tpu.dimension_semantics<parallel>], iteration_bounds = array<i64: 2>, scalar_prefetch = 0 : i64, scratch_operands = 0 : i64, tpu.core_type = #tpu.core_type<tc>, window_params = [{transform_indices = @transform_0, window_bounds = array<i64: 128, 32>}, {pipeline_mode = #tpu.pipeline_mode<synchronous>, transform_indices = @transform_1, window_bounds = array<i64: 128, 128>}, {pipeline_mode = #tpu.pipeline_mode<synchronous>, transform_indices = @transform_2, window_bounds = array<i64: 8, 128>}, {transform_indices = @transform_3, window_bounds = array<i64: 16, 128>}, {pipeline_mode = #tpu.pipeline_mode<synchronous>, transform_indices = @transform_4, window_bounds = array<i64: 416, 128>}, {pipeline_mode = #tpu.pipeline_mode<synchronous>, transform_indices = @transform_5, window_bounds = array<i64: 8, 128>}, {transform_indices = @transform_6, window_bounds = array<i64: 16, 128>}]} {
    %c0 = arith.constant 0 : index
    %c0_0 = arith.constant 0 : index
    %0 = vector.load %arg5[%c0, %c0_0] : memref<416x128xbf16, #tpu.memory_space<vmem>>, vector<32x128xbf16>
    %c32 = arith.constant 32 : index
    %c0_1 = arith.constant 0 : index
    %1 = vector.load %arg5[%c32, %c0_1] : memref<416x128xbf16, #tpu.memory_space<vmem>>, vector<128x128xbf16>
    %c160 = arith.constant 160 : index
    %c0_2 = arith.constant 0 : index
    %2 = vector.load %arg5[%c160, %c0_2] : memref<416x128xbf16, #tpu.memory_space<vmem>>, vector<128x128xbf16>
    %c288 = arith.constant 288 : index
    %c0_3 = arith.constant 0 : index
    %3 = vector.load %arg5[%c288, %c0_3] : memref<416x128xbf16, #tpu.memory_space<vmem>>, vector<128x128xbf16>
    %c0_4 = arith.constant 0 : index
    %c0_5 = arith.constant 0 : index
    %4 = vector.load %arg6[%c0_4, %c0_5] : memref<8x128xf32, #tpu.memory_space<vmem>>, vector<1x128xf32>
    %c1 = arith.constant 1 : index
    %c0_6 = arith.constant 0 : index
    %5 = vector.load %arg6[%c1, %c0_6] : memref<8x128xf32, #tpu.memory_space<vmem>>, vector<1x128xf32>
    %c2 = arith.constant 2 : index
    %c0_7 = arith.constant 0 : index
    %6 = vector.load %arg6[%c2, %c0_7] : memref<8x128xf32, #tpu.memory_space<vmem>>, vector<1x128xf32>
    %c3 = arith.constant 3 : index
    %c0_8 = arith.constant 0 : index
    %7 = vector.load %arg6[%c3, %c0_8] : memref<8x128xf32, #tpu.memory_space<vmem>>, vector<1x128xf32>
    %8 = vector.extract_strided_slice %7 {offsets = [0, 0], sizes = [1, 1], strides = [1, 1]} : vector<1x128xf32> to vector<1x1xf32>
    %9 = vector.extract_strided_slice %7 {offsets = [0, 1], sizes = [1, 1], strides = [1, 1]} : vector<1x128xf32> to vector<1x1xf32>
    %10 = vector.extract_strided_slice %7 {offsets = [0, 2], sizes = [1, 1], strides = [1, 1]} : vector<1x128xf32> to vector<1x1xf32>
    %c0_9 = arith.constant 0 : index
    %c0_10 = arith.constant 0 : index
    %11 = vector.load %arg1[%c0_9, %c0_10] : memref<128x32xbf16, #tpu.memory_space<vmem>>, vector<128x32xbf16>
    %c0_11 = arith.constant 0 : index
    %c0_12 = arith.constant 0 : index
    %12 = vector.load %arg2[%c0_11, %c0_12] : memref<128x128xbf16, #tpu.memory_space<vmem>>, vector<128x128xbf16>
    %c0_13 = arith.constant 0 : index
    %c0_14 = arith.constant 0 : index
    %13 = vector.load %arg3[%c0_13, %c0_14] : memref<8x128xf32, #tpu.memory_space<vmem>>, vector<8x128xf32>
    %c0_15 = arith.constant 0 : index
    %c0_16 = arith.constant 0 : index
    %14 = vector.load %arg4[%c0_15, %c0_16] : memref<16x128xf32, #tpu.memory_space<vmem>>, vector<16x128xf32>
    %cst = arith.constant dense<0.000000e+00> : vector<128x128xf32>
    %15 = tpu.matmul %11, %0, %cst {dimension_numbers = #tpu.dot_dimension_numbers<[1], [0], [0], [1], [0, 0, 1, 1], [], []>} : vector<128x32xbf16>, vector<32x128xbf16>, vector<128x128xf32> -> vector<128x128xf32>
    %16 = arith.truncf %15 : vector<128x128xf32> to vector<128x128xbf16>
    %cst_17 = arith.constant dense<0.000000e+00> : vector<128x128xf32>
    %17 = tpu.matmul %12, %16, %cst_17 {dimension_numbers = #tpu.dot_dimension_numbers<[1], [0], [0], [1], [0, 0, 1, 1], [], []>} : vector<128x128xbf16>, vector<128x128xbf16>, vector<128x128xf32> -> vector<128x128xf32>
    %18 = vector.broadcast %4 : vector<1x128xf32> to vector<128x128xf32>
    %19 = arith.addf %17, %18 : vector<128x128xf32>
    %cst_18 = arith.constant 0.000000e+00 : f32
    %20 = vector.broadcast %cst_18 : f32 to vector<128x128xf32>
    %21 = arith.maximumf %19, %20 : vector<128x128xf32>
    %22 = arith.truncf %21 : vector<128x128xf32> to vector<128x128xbf16>
    %cst_19 = arith.constant dense<0.000000e+00> : vector<128x128xf32>
    %23 = tpu.matmul %22, %1, %cst_19 {dimension_numbers = #tpu.dot_dimension_numbers<[1], [0], [0], [1], [0, 0, 1, 1], [], []>} : vector<128x128xbf16>, vector<128x128xbf16>, vector<128x128xf32> -> vector<128x128xf32>
    %24 = vector.broadcast %5 : vector<1x128xf32> to vector<128x128xf32>
    %25 = arith.addf %23, %24 : vector<128x128xf32>
    %cst_20 = arith.constant 0.000000e+00 : f32
    %26 = vector.broadcast %cst_20 : f32 to vector<128x128xf32>
    %27 = arith.maximumf %25, %26 : vector<128x128xf32>
    %28 = arith.truncf %27 : vector<128x128xf32> to vector<128x128xbf16>
    %cst_21 = arith.constant dense<0.000000e+00> : vector<128x128xf32>
    %29 = tpu.matmul %28, %2, %cst_21 {dimension_numbers = #tpu.dot_dimension_numbers<[1], [0], [0], [1], [0, 0, 1, 1], [], []>} : vector<128x128xbf16>, vector<128x128xbf16>, vector<128x128xf32> -> vector<128x128xf32>
    %30 = vector.broadcast %6 : vector<1x128xf32> to vector<128x128xf32>
    %31 = arith.addf %29, %30 : vector<128x128xf32>
    %cst_22 = arith.constant 0.000000e+00 : f32
    %32 = vector.broadcast %cst_22 : f32 to vector<128x128xf32>
    %33 = arith.maximumf %31, %32 : vector<128x128xf32>
    %34 = arith.truncf %33 : vector<128x128xf32> to vector<128x128xbf16>
    %cst_23 = arith.constant dense<0.000000e+00> : vector<128x128xf32>
    %35 = tpu.matmul %34, %3, %cst_23 {dimension_numbers = #tpu.dot_dimension_numbers<[1], [0], [0], [1], [0, 0, 1, 1], [], []>} : vector<128x128xbf16>, vector<128x128xbf16>, vector<128x128xf32> -> vector<128x128xf32>
    %36 = tpu.iota {dimensions = array<i32: 0>} : vector<8x128xi32>
    %c8_i32 = arith.constant 8 : i32
    %37 = vector.broadcast %c8_i32 : i32 to vector<8x128xi32>
    %38 = arith.cmpi slt, %36, %37 : vector<8x128xi32>
    %39 = arith.extui %38 : vector<8x128xi1> to vector<8x128xi32>
    %40 = arith.sitofp %39 : vector<8x128xi32> to vector<8x128xf32>
    %41 = vector.shape_cast %35 : vector<128x128xf32> to vector<16x8x128xf32>
    %42 = vector.shape_cast %40 : vector<8x128xf32> to vector<1x8x128xf32>
    %43 = vector.broadcast %42 : vector<1x8x128xf32> to vector<16x8x128xf32>
    %44 = arith.mulf %41, %43 : vector<16x8x128xf32>
    %cst_24 = arith.constant dense<0.000000e+00> : vector<16x128xf32>
    %45 = vector.multi_reduction <add>, %44, %cst_24 [1] : vector<16x8x128xf32> to vector<16x128xf32>
    %cst_25 = arith.constant 1.250000e-01 : f32
    %46 = vector.broadcast %cst_25 : f32 to vector<16x128xf32>
    %47 = arith.mulf %45, %46 : vector<16x128xf32>
    %48 = vector.extract_strided_slice %47 {offsets = [0, 1], sizes = [16, 1], strides = [1, 1]} : vector<16x128xf32> to vector<16x1xf32>
    %49 = vector.broadcast %9 : vector<1x1xf32> to vector<16x1xf32>
    %50 = arith.addf %48, %49 : vector<16x1xf32>
    %51 = vector.extract_strided_slice %47 {offsets = [0, 2], sizes = [16, 1], strides = [1, 1]} : vector<16x128xf32> to vector<16x1xf32>
    %52 = vector.broadcast %10 : vector<1x1xf32> to vector<16x1xf32>
    %53 = arith.addf %51, %52 : vector<16x1xf32>
    %54 = vector.extract_strided_slice %44 {offsets = [0, 0, 0], sizes = [16, 8, 1], strides = [1, 1, 1]} : vector<16x8x128xf32> to vector<16x8x1xf32>
    %55 = vector.shape_cast %13 : vector<8x128xf32> to vector<1x8x128xf32>
    %56 = vector.broadcast %55 : vector<1x8x128xf32> to vector<16x8x128xf32>
    %57 = vector.broadcast %54 : vector<16x8x1xf32> to vector<16x8x128xf32>
    %58 = arith.mulf %56, %57 : vector<16x8x128xf32>
    %cst_26 = arith.constant dense<0.000000e+00> : vector<16x128xf32>
    %59 = vector.multi_reduction <add>, %58, %cst_26 [1] : vector<16x8x128xf32> to vector<16x128xf32>
    %60 = vector.broadcast %8 : vector<1x1xf32> to vector<16x128xf32>
    %61 = arith.addf %59, %60 : vector<16x128xf32>
    %62 = tpu.iota {dimensions = array<i32: 1>} : vector<16x128xi32>
    %c8_i32_27 = arith.constant 8 : i32
    %63 = vector.broadcast %c8_i32_27 : i32 to vector<16x128xi32>
    %64 = arith.cmpi slt, %62, %63 : vector<16x128xi32>
    %c8_i32_28 = arith.constant 8 : i32
    %65 = vector.broadcast %c8_i32_28 : i32 to vector<16x128xi32>
    %66 = arith.cmpi eq, %62, %65 : vector<16x128xi32>
    %cst_29 = arith.constant 5.000000e-01 : f32
    %67 = vector.broadcast %cst_29 : f32 to vector<16x128xf32>
    %68 = arith.cmpf ogt, %14, %67 : vector<16x128xf32>
    %69 = arith.andi %64, %68 : vector<16x128xi1>
    %70 = arith.ori %69, %66 : vector<16x128xi1>
    %71 = vector.shape_cast %53 : vector<16x1xf32> to vector<16x1xf32>
    %72 = vector.broadcast %71 : vector<16x1xf32> to vector<16x128xf32>
    %73 = arith.select %66, %72, %61 : vector<16x128xi1>, vector<16x128xf32>
    %cst_30 = arith.constant -1.000000e+30 : f32
    %74 = vector.broadcast %cst_30 : f32 to vector<16x128xf32>
    %75 = arith.select %70, %73, %74 : vector<16x128xi1>, vector<16x128xf32>
    %cst_31 = arith.constant dense<0xFF800000> : vector<16xf32>
    %76 = vector.multi_reduction <maximumf>, %75, %cst_31 [1] : vector<16x128xf32> to vector<16xf32>
    %77 = vector.shape_cast %76 : vector<16xf32> to vector<16x1xf32>
    %78 = vector.broadcast %77 : vector<16x1xf32> to vector<16x128xf32>
    %79 = arith.subf %75, %78 : vector<16x128xf32>
    %80 = math.exp %79 : vector<16x128xf32>
    %cst_32 = arith.constant 0.000000e+00 : f32
    %81 = vector.broadcast %cst_32 : f32 to vector<16x128xf32>
    %82 = arith.select %70, %80, %81 : vector<16x128xi1>, vector<16x128xf32>
    %cst_33 = arith.constant dense<0.000000e+00> : vector<16xf32>
    %83 = vector.multi_reduction <add>, %82, %cst_33 [1] : vector<16x128xf32> to vector<16xf32>
    %84 = vector.shape_cast %83 : vector<16xf32> to vector<16x1xf32>
    %85 = tpu.reciprocal %84 : vector<16x1xf32> -> vector<16x1xf32>
    %86 = vector.broadcast %85 : vector<16x1xf32> to vector<16x128xf32>
    %87 = arith.mulf %82, %86 : vector<16x128xf32>
    %c9_i32 = arith.constant 9 : i32
    %88 = vector.broadcast %c9_i32 : i32 to vector<16x128xi32>
    %89 = arith.cmpi eq, %62, %88 : vector<16x128xi32>
    %90 = vector.shape_cast %50 : vector<16x1xf32> to vector<16x1xf32>
    %91 = vector.broadcast %90 : vector<16x1xf32> to vector<16x128xf32>
    %92 = arith.select %89, %91, %87 : vector<16x128xi1>, vector<16x128xf32>
    %c0_34 = arith.constant 0 : index
    %c0_35 = arith.constant 0 : index
    %93 = vector.load %arg7[%c0_34, %c0_35] : memref<16x128xf32, #tpu.memory_space<vmem>>, vector<16x128xf32>
    tpu.vector_store %arg7[%c0_34, %c0_35], %92 {strides = array<i32>} : memref<16x128xf32, #tpu.memory_space<vmem>>, vector<16x128xf32>,
    return
  }
  func.func @transform_0(%arg0: i32) -> (i32, i32) {
    %c0_i32 = arith.constant 0 : i32
    %c0_i32_0 = arith.constant 0 : i32
    return %arg0, %c0_i32 : i32, i32
  }
  func.func @transform_1(%arg0: i32) -> (i32, i32) {
    %c0_i32 = arith.constant 0 : i32
    %c0_i32_0 = arith.constant 0 : i32
    %c0_i32_1 = arith.constant 0 : i32
    return %c0_i32, %c0_i32_0 : i32, i32
  }
  func.func @transform_2(%arg0: i32) -> (i32, i32) {
    %c0_i32 = arith.constant 0 : i32
    %c0_i32_0 = arith.constant 0 : i32
    %c0_i32_1 = arith.constant 0 : i32
    return %c0_i32, %c0_i32_0 : i32, i32
  }
  func.func @transform_3(%arg0: i32) -> (i32, i32) {
    %c0_i32 = arith.constant 0 : i32
    %c0_i32_0 = arith.constant 0 : i32
    return %arg0, %c0_i32 : i32, i32
  }
  func.func @transform_4(%arg0: i32) -> (i32, i32) {
    %c0_i32 = arith.constant 0 : i32
    %c0_i32_0 = arith.constant 0 : i32
    %c0_i32_1 = arith.constant 0 : i32
    return %c0_i32, %c0_i32_0 : i32, i32
  }
  func.func @transform_5(%arg0: i32) -> (i32, i32) {
    %c0_i32 = arith.constant 0 : i32
    %c0_i32_0 = arith.constant 0 : i32
    %c0_i32_1 = arith.constant 0 : i32
    return %c0_i32, %c0_i32_0 : i32, i32
  }
  func.func @transform_6(%arg0: i32) -> (i32, i32) {
    %c0_i32 = arith.constant 0 : i32
    %c0_i32_0 = arith.constant 0 : i32
    return %arg0, %c0_i32 : i32, i32
  }
}

</mosaic_0001>

<bundles_post_ra>
// kernel: tpu_custom_call.1
= control target key start
LH: loop header
LB: loop body
LE: loop exit
PB: predicated region body
PF: predicated region fallthrough
CT: control target
= control target key end

     0   :  { %11 = vsyncpa [#allocation3], 0  ;;  %s2667_s0 = inlined_call_operand.vmem [shape: bf16[256,32], index: 0, kind: input, shape index: {}]   ;;  %s2668_s1 = inlined_call_operand.vmem [shape: bf16[128,128], index: 1, kind: input, shape index: {}]   ;;  %s2669_s2 = inlined_call_operand.vmem [shape: f32[8,128], index: 2, kind: input, shape index: {}]   ;;  %s2670_s3 = inlined_call_operand.vmem [shape: f32[32,128], index: 3, kind: input, shape index: {}]   ;;  %s2671_s4 = inlined_call_operand.hbm [shape: bf16[416,128], index: 4, kind: input, shape index: {}]   ;;  %s2672_s5 = inlined_call_operand.vmem [shape: f32[8,128], index: 5, kind: input, shape index: {}]   ;;  %s2673_s6 = inlined_call_operand.hbm [shape: f32[32,128], index: 6, kind: output, shape index: {}]  }
   0x1   :  { %12 = vsyncpa [#allocation4], 0 }
   0x2   :  { %14 = vsyncpa [#allocation4 + $0x1], 0  ;;  %s2204_s21 = smov 0   ;;  %s2206_s22 = smov 0  }
   0x3   :  { %s2208_s23 = smov 0   ;;  %s2210_s24 = smov 0  }
   0x4 LB: > { %s2225_s25 = sadd.s32 4294967295, %s2159_s24   ;;  %s1721_s26 = sadd.s32 4294967294, %s2159_s24   ;;  %s2159_s24 = sphi %s2210_s24, %s2683_s24   ;;  %s2155_s23 = sphi %s2208_s23, %s2682_s23   ;;  %s2151_s22 = sphi %s2206_s22, %s2681_s22   ;;  %s2147_s21 = sphi %s2204_s21, %s2680_s21  }
   0x5   : > { %s2229_s27 = sadd.s32 1, %s2159_s24   ;;  %s163_s28 = sadd.s32 1, %s2155_s23 }
   0x6   : > { %s160_s29 = ssub.s32 %s2159_s24, %s2229_s27  ;;  %p173_p0 = scmp.ne.s32.totalorder %s2155_s23, %s2151_s22 }
   0x7   : > { %p161_p1 = scmp.eq.s32.totalorder %s160_s29, 0  ;;  %p174_p2 = scmp.eq.s32.totalorder %s2225_s25, 1 }
   0x8   : > { %p179_p3 = scmp.ne.s32.totalorder %s2151_s22, %s2147_s21  ;;  %p180_p4 = scmp.eq.s32.totalorder %s1721_s26, 1 }
   0x9   : > { %s2240_s30 = scalar_select %p161_p1, %s2155_s23, %s163_s28  }
   0xa   : > { %p2242_p5 = por %p174_p2, %p173_p0  ;;  %p2246_p6 = por %p180_p4, %p179_p3 }
   0xb   : > { %p1722_p7 = scmp.ge.s32.totalorder %s2159_s24, 1  ;;  %p187_p8 = scmp.lt.s32.totalorder %s2159_s24, 3 }
   0xc   : > { %p1978_p9 = scmp.eq.s32.totalorder %s2225_s25, 0  ;;  %s204_s11 = sshll.u32 %s2671_s4, 4  ;;  %s205_s11 = int_to_ptr.hbm [resolvable:$true] %s204_s11 }
   0xd   : > { %p188_p10 = pnand %p1722_p7, %p187_p8  ;;  %s2161_s12 = smov [#allocation2]  }
   0xe   : > { %s206_s13 = sshll.u32 %s2161_s12, 4  ;;  %s2162_s14 = smov 64   ;;  %s207_s13 = int_to_ptr.vmem [resolvable:$true] %s206_s13 }
   0xf   : > { %p1970_p11 = pneg %p188_p10  ;;  %s2163_s15 = smov 4  }
  0x10   : > { %243 = sbr.rel (%p188_p10) target bundleno = 1311 (0x51f), region = 44 }
  0x11   : > { %p1971_p12 = pnand %p1978_p9, %p1970_p11 }
  0x13   : > { %1973 = dma.hbm_to_vmem [thread:$0]  (!%p1971_p12), %s205_s11, 3328, %s207_s13, [#allocation3], %s2162_s14, %s2162_s14, %s2163_s15  }
  0x15   : > { %2138 = dma.done.wait (%p1978_p9), [#allocation3], 3328  }
  0x16   : > { %2140 = vsyncadd (%p1978_p9), [#allocation3], 4294963968  ;;  %s2263_s16 = sshll.u32 %s2225_s25, 4  ;;  %v1914_v0 = vld [vmem:[#allocation2 + $0x8] sm:$0xff]  ;;  %v1913_v1 = vld [vmem:[#allocation2] sm:$0xff]  ;;  %vm436_vm0 = vcmask 261120  }
  0x17   : > { %p280_p13 = scmp.lt.s32.totalorder %s2263_s16, 31  ;;  %1957 = vmatpush.bf16.msra.mxu2 %v1914_v0  ;;  %1958 = vmatpush.bf16.msra.mxu3 %v1914_v0  ;;  %v1947_v34 = vld [vmem:[%s2668_s1] sm:$0xff]  ;;  %v1948_v35 = vld [vmem:[%s2668_s1 + $0x8] sm:$0xff]  ;;  %v1949_v36 = vld [vmem:[%s2668_s1 + $0x10] sm:$0xff]  ;;  %s1730_s28 = sshll.u32 %s2225_s25, 1  ;;  %vm1418_vm1 = vcmask 1041409  }
  0x18   : > { %1956 = vmatpush.bf16.msra.mxu1 %v1914_v0  ;;  %467 = vmatpush.bf16.msra.mxu0 %v1914_v0  ;;  %v1950_v37 = vld [vmem:[%s2668_s1 + $0x18] sm:$0xff]  ;;  %v1922_v38 = vld [vmem:[#allocation2 + $0x48] sm:$0xff]  ;;  %v1951_v39 = vld [vmem:[%s2668_s1 + $0x20] sm:$0xff]  ;;  %p286_p0 = scmp.lt.s32.totalorder %s1730_s28, 3  ;;  %vm1421_vm2 = vcmask 1042434   ;;  %vm1424_vm3 = vcmask 1043459  }
  0x19   : > { %s281_s17 = scalar_select %p280_p13, %s2263_s16, 31  ;;  %v1921_v40 = vld [vmem:[#allocation2 + $0x40] sm:$0xff]  ;;  %v1920_v41 = vld [vmem:[#allocation2 + $0x38] sm:$0xff]  ;;  %v1919_v42 = vld [vmem:[#allocation2 + $0x30] sm:$0xff]  ;;  %vm1427_vm4 = vcmask 1044484   ;;  %vm1430_vm7 = vcmask 1045509  }
  0x1a   : > { %v1952_v43 = vld [vmem:[%s2668_s1 + $0x28] sm:$0xff]  ;;  %v1917_v45 = vld [vmem:[#allocation2 + $0x20] sm:$0xff]  ;;  %v1953_v46 = vld [vmem:[%s2668_s1 + $0x30] sm:$0xff]  ;;  %s2685_s28 = smov (!%p286_p0, %s1730_s28), 3  ;;  %vm1433_vm10 = vcmask 1046534   ;;  %vm1436_vm11 = vcmask 1047559  }
  0x1b   : > { %s1729_s18 = sshll.u32 %s281_s17, 2  ;;  %1960 = vmatpush.bf16.msra.mxu2 %v1913_v1  ;;  %1961 = vmatpush.bf16.msra.mxu3 %v1913_v1  ;;  %v1918_v44 = vld [vmem:[#allocation2 + $0x28] sm:$0xff]  ;;  %v1916_v47 = vld [vmem:[#allocation2 + $0x18] sm:$0xff]  ;;  %v1915_v48 = vld [vmem:[#allocation2 + $0x10] sm:$0xff]  ;;  %s1731_s29 = sshll.u32 %s2685_s28, 3 }
  0x1c   : > { %s283_s26 = scalar_lea.vmem %s2667_s0, %s1729_s18  ;;  %1959 = vmatpush.bf16.msra.mxu1 %v1913_v1  ;;  %468 = vmatpush.bf16.msra.mxu0 %v1913_v1  ;;  %v1954_v49 = vld [vmem:[%s2668_s1 + $0x38] sm:$0xff]  ;;  %v2305_v51 = vld [vmem:[%s2672_s5] ss:$0 sm:$0xff]  ;;  %s2487_s11 = scalar_lea.vmem %s2670_s3, %s1731_s29 }
  0x1d   : > { %v1943_v2 = vld [vmem:[%s283_s26 + $0x20] sm:$0xff]  ;;  %v1946_v3 = vld [vmem:[%s283_s26 + $0x38] sm:$0xff]  ;;  %v1941_v4 = vld [vmem:[%s283_s26 + $0x10] sm:$0xff]  ;;  %s276_s12 = sand.u32 1, %s2151_s22   ;;  %s1631_s18 = scalar_lea.hbm %s2673_s6, %s2263_s16 }
  0x1e   : > { %1776 = vmatmul.msk.bf16.vlgmr.msra.gmra.mxu2 %vm436_vm0, %v1943_v2  ;;  %1779 = vmatmul.msk.bf16.vlgmr.msra.gmra.mxu3 %vm436_vm0, %v1946_v3  ;;  %v1939_v5 = vld [vmem:[%s283_s26] sm:$0xff]  ;;  %v1944_v6 = vld [vmem:[%s283_s26 + $0x28] sm:$0xff]  ;;  %v1942_v7 = vld [vmem:[%s283_s26 + $0x18] sm:$0xff]  ;;  %s1727_s13 = sshll.u32 %s276_s12, 4  ;;  %s2628_s20 = sshll.u32 %s1631_s18, 4  ;;  %s1635_s20 = int_to_ptr.hbm [resolvable:$true] %s2628_s20 }
  0x1f   : > { %1774 = vmatmul.msk.bf16.vlgmr.msra.gmra.mxu1 %vm436_vm0, %v1941_v4  ;;  %1772 = vmatmul.msk.bf16.vlgmr.msra.gmra.mxu0 %vm436_vm0, %v1939_v5  ;;  %v1940_v8 = vld [vmem:[%s283_s26 + $0x8] sm:$0xff]  ;;  %v1945_v9 = vld [vmem:[%s283_s26 + $0x30] sm:$0xff]  ;;  %s2615_s14 = scalar_lea.vmem [#allocation5], %s1727_s13  ;;  %s1620_s16 = scalar_lea.sflag [#allocation4], %s276_s12 }
  0x20   : > { %689 = vmatpush.bf16.msrb.mxu2 %v1922_v38  ;;  %s1632_s19 = sshll.u32 %s2615_s14, 4  ;;  %s2107_s26 = sshra.s32 %s1635_s20, 4  ;;  %s1633_s19 = int_to_ptr.vmem [resolvable:$true] %s1632_s19  ;;  %s2108_s26 = int_to_ptr.hbm [resolvable:$true] %s2107_s26 }
  0x21   : > { %s2109_s28 = scalar_lea.hbm %s2108_s26, 16  ;;  %s2113_s9 = scalar_lea.hbm %s2673_s6, 32 }
  0x22   : > { %p2110_p1 = scmp.ne.s32.totalorder %s2108_s26, %s2109_s28  ;;  %p2114_p4 = scmp.lt.s32.totalorder %s2108_s26, %s2673_s6 }
  0x23   : > { %p2115_p7 = scmp.lt.s32.totalorder %s2113_s9, %s2109_s28 }
  0x24   : > { %690 = vmatpush.bf16.msrb.mxu2 %v1921_v40  ;;  %p2111_p2 = pnand %p2110_p1, %p2242_p5 }
  0x25   : > { %p2116_p8 = por %p2115_p7, %p2114_p4 }
  0x26   : > { %p2112_p3 = pneg %p2111_p2 }
  0x28   : > { %691 = vmatpush.bf16.msrb.mxu2 %v1920_v41  ;;  %v1926_v41 = vld [vmem:[#allocation2 + $0x68] sm:$0xff]  ;;  %p2117_p9 = pnand %p2116_p8, %p2112_p3 }
  0x2c   : > { %692 = vmatpush.bf16.msrb.mxu2 %v1919_v42  ;;  %v1925_v42 = vld [vmem:[#allocation2 + $0x60] sm:$0xff] }
  0x2e   : > { %1777 = vmatmul.msk.bf16.gmra.mxu2 %vm436_vm0, %v1944_v6 }
  0x2f   : > { %1775 = vmatmul.msk.bf16.gmra.mxu1 %vm436_vm0, %v1942_v7  ;;  %1773 = vmatmul.msk.bf16.gmra.mxu0 %vm436_vm0, %v1940_v8 }
  0x30   : > { %693 = vmatpush.bf16.msrb.mxu2 %v1918_v44 }
  0x34   : > { %694 = vmatpush.bf16.msrb.mxu2 %v1917_v45  ;;  %v1924_v45 = vld [vmem:[#allocation2 + $0x58] sm:$0xff] }
  0x38   : > { %695 = vmatpush.bf16.msrb.mxu2 %v1916_v47 }
  0x3c   : > { %696 = vmatpush.bf16.msrb.mxu2 %v1915_v48 }
  0x3e   : > { %1778 = vmatmul.msk.bf16.gmra.mxu2 %vm436_vm0, %v1945_v9 }
  0x9c   : > { %v480_v16 = vpop.f32.mrf.mxu1  ;;  %v470_v18 = vpop.f32.mrf.mxu0 }
  0xa1   : > { %v490_v10 = vpop.f32.mrf.mxu2  ;;  %v505_v11 = vpop.f32.mrf.mxu3 }
  0xa4   : > { %v482_v19 = vpop.f32.mrf.mxu1  ;;  %v472_v21 = vpop.f32.mrf.mxu0 }
  0xa5   : > { %v512_v30 = vpack.c.bf16 %v482_v19, %v480_v16  ;;  %v510_v33 = vpack.c.bf16 %v472_v21, %v470_v18 }
  0xa9   : > { %v492_v12 = vpop.f32.mrf.mxu2  ;;  %v507_v13 = vpop.f32.mrf.mxu3 }
  0xaa   : > { %v517_v14 = vpack.c.bf16 %v507_v13, %v505_v11  ;;  %v514_v27 = vpack.c.bf16 %v492_v12, %v490_v10 }
  0xac   : > { %567 = vmatpush.bf16.msrb.mxu1 %v517_v14  ;;  %v485_v22 = vpop.f32.mrf.mxu1  ;;  %v475_v26 = vpop.f32.mrf.mxu0 }
  0xb1   : > { %v495_v15 = vpop.f32.mrf.mxu2 }
  0xb4   : > { %v487_v28 = vpop.f32.mrf.mxu1  ;;  %v477_v31 = vpop.f32.mrf.mxu0 }
  0xb5   : > { %v513_v29 = vpack.c.bf16 %v487_v28, %v485_v22  ;;  %v511_v32 = vpack.c.bf16 %v477_v31, %v475_v26  ;;  %v1929_v31 = vld [vmem:[#allocation2 + $0x80] sm:$0xff] }
  0xb9   : > { %v497_v17 = vpop.f32.mrf.mxu2 }
  0xba   : > { %v515_v25 = vpack.c.bf16 %v497_v17, %v495_v15 }
  0xc1   : > { %v500_v20 = vpop.f32.mrf.mxu2 }
  0xc9   : > { %v502_v23 = vpop.f32.mrf.mxu2 }
  0xca   : > { %v516_v24 = vpack.c.bf16 %v502_v23, %v500_v20 }
  0xcc   : > { %568 = vmatpush.bf16.msrb.mxu1 %v516_v24 }
  0xd0   : > { %569 = vmatpush.bf16.msrb.mxu1 %v515_v25 }
  0xd4   : > { %570 = vmatpush.bf16.msrb.mxu1 %v514_v27 }
  0xd8   : > { %571 = vmatpush.bf16.msrb.mxu1 %v513_v29  ;;  %v1930_v29 = vld [vmem:[#allocation2 + $0x88] sm:$0xff] }
  0xd9   : > { %811 = vmatpush.bf16.msrb.mxu3 %v1930_v29 }
  0xdc   : > { %572 = vmatpush.bf16.msrb.mxu1 %v512_v30 }
  0xdd   : > { %812 = vmatpush.bf16.msrb.mxu3 %v1929_v31 }
  0xe0   : > { %573 = vmatpush.bf16.msrb.mxu1 %v511_v32  ;;  %v1928_v32 = vld [vmem:[#allocation2 + $0x78] sm:$0xff] }
  0xe1   : > { %813 = vmatpush.bf16.msrb.mxu3 %v1928_v32  ;;  %v1937_v32 = vld [vmem:[#allocation2 + $0xc0] sm:$0xff] }
  0xe4   : > { %574 = vmatpush.bf16.msrb.mxu1 %v510_v33 }
  0xe7   : > { %575 = vmatmul.bf16.vlgmr.msrb.gmra.mxu1 %v1947_v34 }
  0xf7   : > { %580 = vmatmul.bf16.gmra.mxu1 %v1948_v35 }
 0x107   : > { %585 = vmatmul.bf16.gmra.mxu1 %v1949_v36  ;;  %v1927_v36 = vld [vmem:[#allocation2 + $0x70] sm:$0xff] }
 0x108   : > { %814 = vmatpush.bf16.msrb.mxu3 %v1927_v36 }
 0x10c   : > { %815 = vmatpush.bf16.msrb.mxu3 %v1926_v41 }
 0x110   : > { %816 = vmatpush.bf16.msrb.mxu3 %v1925_v42  ;;  %v1934_v42 = vld [vmem:[#allocation2 + $0xa8] sm:$0xff] }
 0x114   : > { %817 = vmatpush.bf16.msrb.mxu3 %v1924_v45 }
 0x117   : > { %590 = vmatmul.bf16.gmra.mxu1 %v1950_v37 }
 0x127   : > { %595 = vmatmul.bf16.gmra.mxu1 %v1951_v39 }
 0x137   : > { %600 = vmatmul.bf16.gmra.mxu1 %v1952_v43 }
 0x147   : > { %605 = vmatmul.bf16.gmra.mxu1 %v1953_v46 }
 0x157   : > { %610 = vmatmul.bf16.gmra.mxu1 %v1954_v49  ;;  %v1923_v49 = vld [vmem:[#allocation2 + $0x50] sm:$0xff] }
 0x158   : > { %818 = vmatpush.bf16.msrb.mxu3 %v1923_v49 }
 0x164   : > { %v576_v50 = vpop.f32.mrf.mxu1 }
 0x165   : > { %v577_v52 = vadd.f32 %v2305_v51, %v576_v50 }
 0x167   : > { %v616_v55 = vmax.f32 %v577_v52, 0.0 }
 0x16c   : > { %v578_v53 = vpop.f32.mrf.mxu1 }
 0x16d   : > { %v579_v54 = vadd.f32 %v2305_v51, %v578_v53  ;;  %v2326_v53 = vld [vmem:[%s2672_s5 + $0x1] ss:$0 sm:$0xff] }
 0x16f   : > { %v617_v56 = vmax.f32 %v579_v54, 0.0 }
 0x171   : > { %v632_v57 = vpack.c.bf16 %v617_v56, %v616_v55 }
 0x173   : > { %697 = vmatmul.bf16.vlgmr.msrb.gmra.mxu2 %v632_v57 }
 0x174   : > { %v581_v58 = vpop.f32.mrf.mxu1 }
 0x175   : > { %v582_v59 = vadd.f32 %v2305_v51, %v581_v58 }
 0x177   : > { %v618_v62 = vmax.f32 %v582_v59, 0.0 }
 0x17c   : > { %v583_v60 = vpop.f32.mrf.mxu1 }
 0x17d   : > { %v584_v61 = vadd.f32 %v2305_v51, %v583_v60 }
 0x17f   : > { %v619_v63 = vmax.f32 %v584_v61, 0.0 }
 0x181   : > { %v633_v0 = vpack.c.bf16 %v619_v63, %v618_v62 }
 0x183   : > { %702 = vmatmul.bf16.gmra.mxu2 %v633_v0 }
 0x184   : > { %v586_v1 = vpop.f32.mrf.mxu1 }
 0x185   : > { %v587_v2 = vadd.f32 %v2305_v51, %v586_v1 }
 0x187   : > { %v620_v5 = vmax.f32 %v587_v2, 0.0 }
 0x18c   : > { %v588_v3 = vpop.f32.mrf.mxu1 }
 0x18d   : > { %v589_v4 = vadd.f32 %v2305_v51, %v588_v3 }
 0x18f   : > { %v621_v6 = vmax.f32 %v589_v4, 0.0 }
 0x191   : > { %v634_v7 = vpack.c.bf16 %v621_v6, %v620_v5 }
 0x193   : > { %707 = vmatmul.bf16.gmra.mxu2 %v634_v7 }
 0x194   : > { %v591_v8 = vpop.f32.mrf.mxu1 }
 0x195   : > { %v592_v9 = vadd.f32 %v2305_v51, %v591_v8 }
 0x197   : > { %v622_v12 = vmax.f32 %v592_v9, 0.0 }
 0x19c   : > { %v593_v10 = vpop.f32.mrf.mxu1 }
 0x19d   : > { %v594_v11 = vadd.f32 %v2305_v51, %v593_v10 }
 0x19f   : > { %v623_v13 = vmax.f32 %v594_v11, 0.0 }
 0x1a1   : > { %v635_v14 = vpack.c.bf16 %v623_v13, %v622_v12 }
 0x1a3   : > { %712 = vmatmul.bf16.gmra.mxu2 %v635_v14 }
 0x1a4   : > { %v596_v15 = vpop.f32.mrf.mxu1 }
 0x1a5   : > { %v597_v16 = vadd.f32 %v2305_v51, %v596_v15 }
 0x1a7   : > { %v624_v19 = vmax.f32 %v597_v16, 0.0 }
 0x1ac   : > { %v598_v17 = vpop.f32.mrf.mxu1 }
 0x1ad   : > { %v599_v18 = vadd.f32 %v2305_v51, %v598_v17 }
 0x1af   : > { %v625_v20 = vmax.f32 %v599_v18, 0.0 }
 0x1b1   : > { %v636_v21 = vpack.c.bf16 %v625_v20, %v624_v19 }
 0x1b3   : > { %717 = vmatmul.bf16.gmra.mxu2 %v636_v21 }
 0x1b4   : > { %v601_v22 = vpop.f32.mrf.mxu1 }
 0x1b5   : > { %v602_v23 = vadd.f32 %v2305_v51, %v601_v22 }
 0x1b7   : > { %v626_v26 = vmax.f32 %v602_v23, 0.0 }
 0x1bc   : > { %v603_v24 = vpop.f32.mrf.mxu1 }
 0x1bd   : > { %v604_v25 = vadd.f32 %v2305_v51, %v603_v24 }
 0x1bf   : > { %v627_v27 = vmax.f32 %v604_v25, 0.0 }
 0x1c1   : > { %v637_v28 = vpack.c.bf16 %v627_v27, %v626_v26 }
 0x1c3   : > { %722 = vmatmul.bf16.gmra.mxu2 %v637_v28 }
 0x1c4   : > { %v606_v30 = vpop.f32.mrf.mxu1 }
 0x1c5   : > { %v607_v33 = vadd.f32 %v2305_v51, %v606_v30  ;;  %v1938_v30 = vld [vmem:[#allocation2 + $0xc8] sm:$0xff] }
 0x1c6   : > { %932 = vmatpush.bf16.msrb.mxu0 %v1938_v30 }
 0x1c7   : > { %v628_v37 = vmax.f32 %v607_v33, 0.0  ;;  %v1936_v33 = vld [vmem:[#allocation2 + $0xb8] sm:$0xff] }
 0x1ca   : > { %933 = vmatpush.bf16.msrb.mxu0 %v1937_v32  ;;  %v2164_v32 = vmov 0  }
 0x1cb   : > { %2021 = vset.pattern.permute.xlu0 %v2164_v32  ;;  %2022 = vset.pattern.permute.xlu1 %v2164_v32 }
 0x1cc   : > { %v608_v34 = vpop.f32.mrf.mxu1 }
 0x1cd   : > { %v609_v35 = vadd.f32 %v2305_v51, %v608_v34 }
 0x1ce   : > { %934 = vmatpush.bf16.msrb.mxu0 %v1936_v33 }
 0x1cf   : > { %v629_v38 = vmax.f32 %v609_v35, 0.0 }
 0x1d1   : > { %v638_v39 = vpack.c.bf16 %v629_v38, %v628_v37  ;;  %v1935_v37 = vld [vmem:[#allocation2 + $0xb0] sm:$0xff] }
 0x1d2   : > { %935 = vmatpush.bf16.msrb.mxu0 %v1935_v37 }
 0x1d3   : > { %727 = vmatmul.bf16.gmra.mxu2 %v638_v39 }
 0x1d4   : > { %v611_v40 = vpop.f32.mrf.mxu1 }
 0x1d5   : > { %v612_v43 = vadd.f32 %v2305_v51, %v611_v40 }
 0x1d6   : > { %936 = vmatpush.bf16.msrb.mxu0 %v1934_v42 }
 0x1d7   : > { %v630_v47 = vmax.f32 %v612_v43, 0.0  ;;  %v1933_v43 = vld [vmem:[#allocation2 + $0xa0] sm:$0xff] }
 0x1da   : > { %937 = vmatpush.bf16.msrb.mxu0 %v1933_v43 }
 0x1dc   : > { %v613_v44 = vpop.f32.mrf.mxu1 }
 0x1dd   : > { %v614_v46 = vadd.f32 %v2305_v51, %v613_v44 }
 0x1df   : > { %v631_v48 = vmax.f32 %v614_v46, 0.0  ;;  %v1932_v46 = vld [vmem:[#allocation2 + $0x98] sm:$0xff] }
 0x1e0   : > { %938 = vmatpush.bf16.msrb.mxu0 %v1932_v46  ;;  %v2165_v46 = vmov 2  }
 0x1e1   : > { %v639_v50 = vpack.c.bf16 %v631_v48, %v630_v47  ;;  %2025 = vset.pattern.permute.xlu2 %v2165_v46 }
 0x1e3   : > { %732 = vmatmul.bf16.gmra.mxu2 %v639_v50  ;;  %v1931_v50 = vld [vmem:[#allocation2 + $0x90] sm:$0xff] }
 0x1e4   : > { %939 = vmatpush.bf16.msrb.mxu0 %v1931_v50 }
 0x1f6   : > { %v698_v52 = vpop.f32.mrf.mxu2 }
 0x1f7   : > { %v699_v54 = vadd.f32 %v2326_v53, %v698_v52 }
 0x1f9   : > { %v738_v57 = vmax.f32 %v699_v54, 0.0 }
 0x1fe   : > { %v700_v55 = vpop.f32.mrf.mxu2 }
 0x1ff   : > { %v701_v56 = vadd.f32 %v2326_v53, %v700_v55  ;;  %v2053_v55 = vld [vmem:[%s2672_s5 + $0x2] ss:$0 sm:$0xff] }
 0x201   : > { %v739_v51 = vmax.f32 %v701_v56, 0.0 }
 0x203   : > { %v754_v58 = vpack.c.bf16 %v739_v51, %v738_v57 }
 0x205   : > { %819 = vmatmul.bf16.vlgmr.msrb.gmra.mxu3 %v754_v58 }
 0x206   : > { %v703_v59 = vpop.f32.mrf.mxu2 }
 0x207   : > { %v704_v60 = vadd.f32 %v2326_v53, %v703_v59 }
 0x209   : > { %v740_v63 = vmax.f32 %v704_v60, 0.0 }
 0x20e   : > { %v705_v61 = vpop.f32.mrf.mxu2 }
 0x20f   : > { %v706_v62 = vadd.f32 %v2326_v53, %v705_v61 }
 0x211   : > { %v741_v0 = vmax.f32 %v706_v62, 0.0 }
 0x213   : > { %v755_v1 = vpack.c.bf16 %v741_v0, %v740_v63 }
 0x215   : > { %824 = vmatmul.bf16.gmra.mxu3 %v755_v1 }
 0x216   : > { %v708_v2 = vpop.f32.mrf.mxu2 }
 0x217   : > { %v709_v3 = vadd.f32 %v2326_v53, %v708_v2 }
 0x219   : > { %v742_v6 = vmax.f32 %v709_v3, 0.0 }
 0x21e   : > { %v710_v4 = vpop.f32.mrf.mxu2 }
 0x21f   : > { %v711_v5 = vadd.f32 %v2326_v53, %v710_v4 }
 0x221   : > { %v743_v7 = vmax.f32 %v711_v5, 0.0 }
 0x223   : > { %v756_v8 = vpack.c.bf16 %v743_v7, %v742_v6 }
 0x225   : > { %829 = vmatmul.bf16.gmra.mxu3 %v756_v8 }
 0x226   : > { %v713_v9 = vpop.f32.mrf.mxu2 }
 0x227   : > { %v714_v10 = vadd.f32 %v2326_v53, %v713_v9 }
 0x229   : > { %v744_v13 = vmax.f32 %v714_v10, 0.0 }
 0x22e   : > { %v715_v11 = vpop.f32.mrf.mxu2 }
 0x22f   : > { %v716_v12 = vadd.f32 %v2326_v53, %v715_v11 }
 0x231   : > { %v745_v14 = vmax.f32 %v716_v12, 0.0 }
 0x233   : > { %v757_v15 = vpack.c.bf16 %v745_v14, %v744_v13 }
 0x235   : > { %834 = vmatmul.bf16.gmra.mxu3 %v757_v15 }
 0x236   : > { %v718_v16 = vpop.f32.mrf.mxu2 }
 0x237   : > { %v719_v17 = vadd.f32 %v2326_v53, %v718_v16 }
 0x239   : > { %v746_v20 = vmax.f32 %v719_v17, 0.0 }
 0x23e   : > { %v720_v18 = vpop.f32.mrf.mxu2 }
 0x23f   : > { %v721_v19 = vadd.f32 %v2326_v53, %v720_v18 }
 0x241   : > { %v747_v21 = vmax.f32 %v721_v19, 0.0 }
 0x243   : > { %v758_v22 = vpack.c.bf16 %v747_v21, %v746_v20 }
 0x245   : > { %839 = vmatmul.bf16.gmra.mxu3 %v758_v22 }
 0x246   : > { %v723_v23 = vpop.f32.mrf.mxu2 }
 0x247   : > { %v724_v24 = vadd.f32 %v2326_v53, %v723_v23 }
 0x249   : > { %v748_v27 = vmax.f32 %v724_v24, 0.0 }
 0x24e   : > { %v725_v25 = vpop.f32.mrf.mxu2 }
 0x24f   : > { %v726_v26 = vadd.f32 %v2326_v53, %v725_v25 }
 0x251   : > { %v749_v28 = vmax.f32 %v726_v26, 0.0 }
 0x253   : > { %v759_v29 = vpack.c.bf16 %v749_v28, %v748_v27 }
 0x255   : > { %844 = vmatmul.bf16.gmra.mxu3 %v759_v29 }
 0x256   : > { %v728_v31 = vpop.f32.mrf.mxu2 }
 0x257   : > { %v729_v34 = vadd.f32 %v2326_v53, %v728_v31 }
 0x259   : > { %v750_v38 = vmax.f32 %v729_v34, 0.0 }
 0x25e   : > { %v730_v35 = vpop.f32.mrf.mxu2 }
 0x25f   : > { %v731_v36 = vadd.f32 %v2326_v53, %v730_v35 }
 0x261   : > { %v751_v39 = vmax.f32 %v731_v36, 0.0 }
 0x263   : > { %v760_v40 = vpack.c.bf16 %v751_v39, %v750_v38 }
 0x265   : > { %849 = vmatmul.bf16.gmra.mxu3 %v760_v40 }
 0x266   : > { %v733_v41 = vpop.f32.mrf.mxu2 }
 0x267   : > { %v734_v44 = vadd.f32 %v2326_v53, %v733_v41 }
 0x269   : > { %v752_v48 = vmax.f32 %v734_v44, 0.0 }
 0x26e   : > { %v735_v45 = vpop.f32.mrf.mxu2 }
 0x26f   : > { %v736_v47 = vadd.f32 %v2326_v53, %v735_v45 }
 0x271   : > { %v753_v49 = vmax.f32 %v736_v47, 0.0 }
 0x273   : > { %v761_v52 = vpack.c.bf16 %v753_v49, %v752_v48  ;;  %v348_v49 = vld [vmem:[%s2672_s5 + $0x3] sm:$0x1] }
 0x274   : > { %1962 = vpush %v348_v49 }
 0x275   : > { %854 = vmatmul.bf16.gmra.mxu3 %v761_v52 }
 0x288   : > { %v820_v54 = vpop.f32.mrf.mxu3 }
 0x289   : > { %v821_v56 = vadd.f32 %v2053_v55, %v820_v54 }
 0x28b   : > { %v860_v58 = vmax.f32 %v821_v56, 0.0 }
 0x290   : > { %v822_v57 = vpop.f32.mrf.mxu3 }
 0x291   : > { %v823_v51 = vadd.f32 %v2053_v55, %v822_v57 }
 0x293   : > { %v861_v59 = vmax.f32 %v823_v51, 0.0 }
 0x295   : > { %v876_v60 = vpack.c.bf16 %v861_v59, %v860_v58 }
 0x297   : > { %940 = vmatmul.bf16.vlgmr.msrb.gmra.mxu0 %v876_v60 }
 0x298   : > { %v825_v53 = vpop.f32.mrf.mxu3 }
 0x299   : > { %v826_v61 = vadd.f32 %v2053_v55, %v825_v53 }
 0x29b   : > { %v862_v0 = vmax.f32 %v826_v61, 0.0 }
 0x2a0   : > { %v827_v62 = vpop.f32.mrf.mxu3 }
 0x2a1   : > { %v828_v63 = vadd.f32 %v2053_v55, %v827_v62 }
 0x2a3   : > { %v863_v1 = vmax.f32 %v828_v63, 0.0 }
 0x2a5   : > { %v877_v2 = vpack.c.bf16 %v863_v1, %v862_v0  ;;  %v2357_v1 = vld [vmem:[%s2672_s5 + $0x3] ss:$0 sm:$0xff]  ;;  %s1963_s25 = spop %1962 }
 0x2a7   : > { %945 = vmatmul.bf16.gmra.mxu0 %v877_v2 }
 0x2a8   : > { %v830_v3 = vpop.f32.mrf.mxu3 }
 0x2a9   : > { %v831_v4 = vadd.f32 %v2053_v55, %v830_v3 }
 0x2ab   : > { %v864_v7 = vmax.f32 %v831_v4, 0.0 }
 0x2b0   : > { %v832_v5 = vpop.f32.mrf.mxu3 }
 0x2b1   : > { %v833_v6 = vadd.f32 %v2053_v55, %v832_v5 }
 0x2b3   : > { %v865_v8 = vmax.f32 %v833_v6, 0.0 }
 0x2b5   : > { %v878_v9 = vpack.c.bf16 %v865_v8, %v864_v7 }
 0x2b7   : > { %950 = vmatmul.bf16.gmra.mxu0 %v878_v9 }
 0x2b8   : > { %v835_v10 = vpop.f32.mrf.mxu3 }
 0x2b9   : > { %v836_v11 = vadd.f32 %v2053_v55, %v835_v10 }
 0x2bb   : > { %v866_v14 = vmax.f32 %v836_v11, 0.0 }
 0x2c0   : > { %v837_v12 = vpop.f32.mrf.mxu3 }
 0x2c1   : > { %v838_v13 = vadd.f32 %v2053_v55, %v837_v12 }
 0x2c3   : > { %v867_v15 = vmax.f32 %v838_v13, 0.0 }
 0x2c5   : > { %v879_v16 = vpack.c.bf16 %v867_v15, %v866_v14 }
 0x2c7   : > { %955 = vmatmul.bf16.gmra.mxu0 %v879_v16 }
 0x2c8   : > { %v840_v17 = vpop.f32.mrf.mxu3 }
 0x2c9   : > { %v841_v18 = vadd.f32 %v2053_v55, %v840_v17 }
 0x2cb   : > { %v868_v21 = vmax.f32 %v841_v18, 0.0 }
 0x2d0   : > { %v842_v19 = vpop.f32.mrf.mxu3 }
 0x2d1   : > { %v843_v20 = vadd.f32 %v2053_v55, %v842_v19 }
 0x2d3   : > { %v869_v22 = vmax.f32 %v843_v20, 0.0 }
 0x2d5   : > { %v880_v23 = vpack.c.bf16 %v869_v22, %v868_v21 }
 0x2d7   : > { %960 = vmatmul.bf16.gmra.mxu0 %v880_v23 }
 0x2d8   : > { %v845_v24 = vpop.f32.mrf.mxu3 }
 0x2d9   : > { %v846_v25 = vadd.f32 %v2053_v55, %v845_v24 }
 0x2db   : > { %v870_v28 = vmax.f32 %v846_v25, 0.0 }
 0x2e0   : > { %v847_v26 = vpop.f32.mrf.mxu3 }
 0x2e1   : > { %v848_v27 = vadd.f32 %v2053_v55, %v847_v26 }
 0x2e3   : > { %v871_v29 = vmax.f32 %v848_v27, 0.0 }
 0x2e5   : > { %v881_v30 = vpack.c.bf16 %v871_v29, %v870_v28 }
 0x2e7   : > { %965 = vmatmul.bf16.gmra.mxu0 %v881_v30 }
 0x2e8   : > { %v850_v31 = vpop.f32.mrf.mxu3 }
 0x2e9   : > { %v851_v33 = vadd.f32 %v2053_v55, %v850_v31 }
 0x2eb   : > { %v872_v36 = vmax.f32 %v851_v33, 0.0 }
 0x2f0   : > { %v852_v34 = vpop.f32.mrf.mxu3 }
 0x2f1   : > { %v853_v35 = vadd.f32 %v2053_v55, %v852_v34 }
 0x2f3   : > { %v873_v37 = vmax.f32 %v853_v35, 0.0 }
 0x2f5   : > { %v882_v38 = vpack.c.bf16 %v873_v37, %v872_v36 }
 0x2f7   : > { %970 = vmatmul.bf16.gmra.mxu0 %v882_v38 }
 0x2f8   : > { %v855_v39 = vpop.f32.mrf.mxu3 }
 0x2f9   : > { %v856_v40 = vadd.f32 %v2053_v55, %v855_v39 }
 0x2fb   : > { %v874_v43 = vmax.f32 %v856_v40, 0.0 }
 0x300   : > { %v857_v41 = vpop.f32.mrf.mxu3 }
 0x301   : > { %v858_v42 = vadd.f32 %v2053_v55, %v857_v41 }
 0x303   : > { %v875_v44 = vmax.f32 %v858_v42, 0.0 }
 0x305   : > { %v883_v45 = vpack.c.bf16 %v875_v44, %v874_v43 }
 0x307   : > { %975 = vmatmul.bf16.gmra.mxu0 %v883_v45 }
 0x314   : > { %v941_v47 = vpop.f32.mrf.mxu0 }
 0x315   : > { %v1002_v48 = vrot.slane %v941_v47, 4  ;;  %1133 = vperm.xlu0 %2021, %v941_v47  }
 0x317   : > { %v1003_v50 = vadd.f32 %v1002_v48, %v941_v47 }
 0x319   : > { %v1004_v52 = vrot.slane %v1003_v50, 2 }
 0x31b   : > { %v1005_v54 = vadd.f32 %v1004_v52, %v1003_v50 }
 0x31c   : > { %v943_v56 = vpop.f32.mrf.mxu0 }
 0x31d   : > { %v1008_v55 = vrot.slane %v943_v56, 4  ;;  %1138 = vperm.xlu0 %2021, %v943_v56   ;;  %v1006_v51 = vrot.slane %v1005_v54, 1 }
 0x31f   : > { %v1009_v57 = vadd.f32 %v1008_v55, %v943_v56  ;;  %v1007_v53 = vadd.f32 %v1006_v51, %v1005_v54 }
 0x321   : > { %v1010_v58 = vrot.slane %v1009_v57, 2  ;;  %v1098_v2 = vmul.f32 0.125, %v1007_v53 }
 0x323   : > { %v1011_v59 = vadd.f32 %v1010_v58, %v1009_v57  ;;  %v2363_v8 = vadd.f32 %v2357_v1, %v1098_v2 }
 0x324   : > { %v946_v60 = vpop.f32.mrf.mxu0 }
 0x325   : > { %v1014_v61 = vrot.slane %v946_v60, 4  ;;  %1143 = vperm.xlu1 %2022, %v946_v60   ;;  %v1012_v62 = vrot.slane %v1011_v59, 1  ;;  %2027 = vset.pattern.permute.xlu0 %v2165_v46 }
 0x327   : > { %v1015_v63 = vadd.f32 %v1014_v61, %v946_v60  ;;  %v1013_v0 = vadd.f32 %v1012_v62, %v1011_v59 }
 0x329   : > { %v1016_v3 = vrot.slane %v1015_v63, 2  ;;  %v1099_v4 = vmul.f32 0.125, %v1013_v0 }
 0x32b   : > { %v1017_v5 = vadd.f32 %v1016_v3, %v1015_v63  ;;  %v2360_v6 = vadd.f32 %v2357_v1, %v1099_v4 }
 0x32c   : > { %v948_v7 = vpop.f32.mrf.mxu0 }
 0x32d   : > { %v1018_v9 = vrot.slane %v1017_v5, 1  ;;  %v1020_v10 = vrot.slane %v948_v7, 4  ;;  %1359 = vperm.xlu2 %2025, %v2360_v6   ;;  %2023 = vset.pattern.permute.xlu1 %v2165_v46 }
 0x32e   : > { %1355 = vperm.xlu1 %2023, %v2363_v8  }
 0x32f   : > { %v1021_v11 = vadd.f32 %v1020_v10, %v948_v7  ;;  %v1019_v12 = vadd.f32 %v1018_v9, %v1017_v5 }
 0x331   : > { %v1022_v13 = vrot.slane %v1021_v11, 2  ;;  %v1100_v14 = vmul.f32 0.125, %v1019_v12 }
 0x333   : > { %v1023_v15 = vadd.f32 %v1022_v13, %v1021_v11  ;;  %v2369_v16 = vadd.f32 %v2357_v1, %v1100_v14 }
 0x334   : > { %v951_v17 = vpop.f32.mrf.mxu0 }
 0x335   : > { %v1024_v18 = vrot.slane %v1023_v15, 1  ;;  %v1026_v19 = vrot.slane %v951_v17, 4  ;;  %2026 = vset.pattern.permute.xlu2 %v2164_v32  ;;  %1363 = vperm.xlu0 %2027, %v2369_v16  }
 0x336   : > { %2024 = vset.pattern.permute.xlu1 %v2164_v32  ;;  %1153 = vperm.xlu2 %2026, %v951_v17  }
 0x337   : > { %v1027_v20 = vadd.f32 %v1026_v19, %v951_v17  ;;  %1148 = vperm.xlu1 %2024, %v948_v7   ;;  %v1025_v21 = vadd.f32 %v1024_v18, %v1023_v15 }
 0x339   : > { %v1028_v22 = vrot.slane %v1027_v20, 2  ;;  %v1101_v23 = vmul.f32 0.125, %v1025_v21 }
 0x33b   : > { %v1029_v24 = vadd.f32 %v1028_v22, %v1027_v20  ;;  %v2376_v28 = vadd.f32 %v2357_v1, %v1101_v23 }
 0x33c   : > { %v953_v25 = vpop.f32.mrf.mxu0 }
 0x33d   : > { %v1030_v26 = vrot.slane %v1029_v24, 1  ;;  %v1032_v27 = vrot.slane %v953_v25, 4  ;;  %2029 = vset.pattern.permute.xlu0 %v2164_v32 }
 0x33e   : > { %1158 = vperm.xlu2 %2026, %v953_v25  }
 0x33f   : > { %v1033_v29 = vadd.f32 %v1032_v27, %v953_v25  ;;  %2028 = vset.pattern.permute.xlu1 %v2165_v46  ;;  %v1031_v30 = vadd.f32 %v1030_v26, %v1029_v24 }
 0x340   : > { %1367 = vperm.xlu1 %2028, %v2376_v28  }
 0x341   : > { %v1034_v31 = vrot.slane %v1033_v29, 2  ;;  %v1102_v33 = vmul.f32 0.125, %v1031_v30 }
 0x343   : > { %v1035_v34 = vadd.f32 %v1034_v31, %v1033_v29  ;;  %v2381_v37 = vadd.f32 %v2357_v1, %v1102_v33 }
 0x344   : > { %v956_v35 = vpop.f32.mrf.mxu0 }
 0x345   : > { %v1038_v36 = vrot.slane %v956_v35, 4  ;;  %1163 = vperm.xlu0 %2029, %v956_v35   ;;  %v1036_v39 = vrot.slane %v1035_v34, 1 }
 0x346   : > { %2030 = vset.pattern.permute.xlu2 %v2165_v46 }
 0x347   : > { %v1039_v38 = vadd.f32 %v1038_v36, %v956_v35  ;;  %1371 = vperm.xlu2 %2030, %v2381_v37   ;;  %v1037_v43 = vadd.f32 %v1036_v39, %v1035_v34 }
 0x348   : > { %2031 = vset.pattern.permute.xlu1 %v2164_v32 }
 0x349   : > { %v1040_v40 = vrot.slane %v1039_v38, 2  ;;  %v1103_v48 = vmul.f32 0.125, %v1037_v43 }
 0x34b   : > { %v1041_v41 = vadd.f32 %v1040_v40, %v1039_v38  ;;  %v2388_v54 = vadd.f32 %v2357_v1, %v1103_v48 }
 0x34c   : > { %v958_v42 = vpop.f32.mrf.mxu0 }
 0x34d   : > { %v1044_v44 = vrot.slane %v958_v42, 4  ;;  %1168 = vperm.xlu1 %2031, %v958_v42   ;;  %v1042_v47 = vrot.slane %v1041_v41, 1 }
 0x34f   : > { %v1045_v45 = vadd.f32 %v1044_v44, %v958_v42  ;;  %2033 = vset.pattern.permute.xlu2 %v2164_v32  ;;  %v1043_v56 = vadd.f32 %v1042_v47, %v1041_v41 }
 0x351   : > { %v1046_v49 = vrot.slane %v1045_v45, 2  ;;  %v1104_v58 = vmul.f32 0.125, %v1043_v56 }
 0x353   : > { %v1047_v50 = vadd.f32 %v1046_v49, %v1045_v45  ;;  %v2393_v61 = vadd.f32 %v2357_v1, %v1104_v58 }
 0x354   : > { %v961_v52 = vpop.f32.mrf.mxu0 }
 0x355   : > { %v1050_v55 = vrot.slane %v961_v52, 4  ;;  %2032 = vset.pattern.permute.xlu1 %v2165_v46  ;;  %1173 = vperm.xlu2 %2033, %v961_v52   ;;  %v1048_v51 = vrot.slane %v1047_v50, 1 }
 0x356   : > { %1375 = vperm.xlu1 %2032, %v2388_v54  }
 0x357   : > { %v1051_v57 = vadd.f32 %v1050_v55, %v961_v52  ;;  %v1049_v62 = vadd.f32 %v1048_v51, %v1047_v50 }
 0x359   : > { %v1052_v59 = vrot.slane %v1051_v57, 2  ;;  %v1105_v3 = vmul.f32 0.125, %v1049_v62 }
 0x35b   : > { %v1053_v60 = vadd.f32 %v1052_v59, %v1051_v57  ;;  %v2399_v9 = vadd.f32 %v2357_v1, %v1105_v3 }
 0x35c   : > { %v963_v53 = vpop.f32.mrf.mxu0 }
 0x35d   : > { %v1056_v63 = vrot.slane %v963_v53, 4  ;;  %2034 = vset.pattern.permute.xlu2 %v2165_v46  ;;  %1178 = vperm.xlu0 %2029, %v963_v53   ;;  %v1054_v2 = vrot.slane %v1053_v60, 1 }
 0x35e   : > { %1379 = vperm.xlu2 %2034, %v2393_v61   ;;  %2036 = vset.pattern.permute.xlu1 %v2164_v32 }
 0x35f   : > { %v1057_v0 = vadd.f32 %v1056_v63, %v963_v53  ;;  %v1055_v10 = vadd.f32 %v1054_v2, %v1053_v60 }
 0x361   : > { %v1058_v4 = vrot.slane %v1057_v0, 2  ;;  %v1106_v14 = vmul.f32 0.125, %v1055_v10 }
 0x363   : > { %v1059_v5 = vadd.f32 %v1058_v4, %v1057_v0  ;;  %v2405_v19 = vadd.f32 %v2357_v1, %v1106_v14 }
 0x364   : > { %v966_v7 = vpop.f32.mrf.mxu0 }
 0x365   : > { %v1062_v11 = vrot.slane %v966_v7, 4  ;;  %2035 = vset.pattern.permute.xlu0 %v2165_v46  ;;  %1183 = vperm.xlu1 %2036, %v966_v7   ;;  %v1060_v13 = vrot.slane %v1059_v5, 1 }
 0x366   : > { %1383 = vperm.xlu0 %2035, %v2399_v9   ;;  %2038 = vset.pattern.permute.xlu2 %v2164_v32 }
 0x367   : > { %v1063_v12 = vadd.f32 %v1062_v11, %v966_v7  ;;  %v1061_v20 = vadd.f32 %v1060_v13, %v1059_v5 }
 0x369   : > { %v1064_v15 = vrot.slane %v1063_v12, 2  ;;  %v1107_v24 = vmul.f32 0.125, %v1061_v20  ;;  %v2166_v20 = vmov 1  }
 0x36b   : > { %v1065_v17 = vadd.f32 %v1064_v15, %v1063_v12  ;;  %v2411_v29 = vadd.f32 %v2357_v1, %v1107_v24 }
 0x36c   : > { %v968_v18 = vpop.f32.mrf.mxu0 }
 0x36d   : > { %v1068_v21 = vrot.slane %v968_v18, 4  ;;  %2037 = vset.pattern.permute.xlu1 %v2165_v46  ;;  %1188 = vperm.xlu2 %2038, %v968_v18   ;;  %v1066_v23 = vrot.slane %v1065_v17, 1 }
 0x36e   : > { %1387 = vperm.xlu1 %2037, %v2405_v19   ;;  %2040 = vset.pattern.permute.xlu0 %v2164_v32 }
 0x36f   : > { %v1069_v22 = vadd.f32 %v1068_v21, %v968_v18  ;;  %v1067_v30 = vadd.f32 %v1066_v23, %v1065_v17 }
 0x371   : > { %v1070_v25 = vrot.slane %v1069_v22, 2  ;;  %v1108_v35 = vmul.f32 0.125, %v1067_v30 }
 0x373   : > { %v1071_v26 = vadd.f32 %v1070_v25, %v1069_v22  ;;  %v2417_v40 = vadd.f32 %v2357_v1, %v1108_v35  ;;  %v2458_v25 = vld [vmem:[%s2669_s2] sm:$0xff] }
 0x374   : > { %v971_v27 = vpop.f32.mrf.mxu0 }
 0x375   : > { %v1074_v31 = vrot.slane %v971_v27, 4  ;;  %2039 = vset.pattern.permute.xlu2 %v2165_v46  ;;  %1193 = vperm.xlu0 %2040, %v971_v27   ;;  %v1072_v34 = vrot.slane %v1071_v26, 1 }
 0x376   : > { %1391 = vperm.xlu2 %2039, %v2411_v29   ;;  %2042 = vset.pattern.permute.xlu1 %v2164_v32 }
 0x377   : > { %v1075_v33 = vadd.f32 %v1074_v31, %v971_v27  ;;  %v1073_v41 = vadd.f32 %v1072_v34, %v1071_v26 }
 0x379   : > { %v1076_v36 = vrot.slane %v1075_v33, 2  ;;  %v1109_v45 = vmul.f32 0.125, %v1073_v41 }
 0x37b   : > { %v1077_v38 = vadd.f32 %v1076_v36, %v1075_v33  ;;  %v2423_v50 = vadd.f32 %v2357_v1, %v1109_v45 }
 0x37c   : > { %v973_v39 = vpop.f32.mrf.mxu0 }
 0x37d   : > { %v1080_v42 = vrot.slane %v973_v39, 4  ;;  %2041 = vset.pattern.permute.xlu0 %v2165_v46  ;;  %1198 = vperm.xlu1 %2042, %v973_v39   ;;  %v1078_v44 = vrot.slane %v1077_v38, 1 }
 0x37e   : > { %1395 = vperm.xlu0 %2041, %v2417_v40   ;;  %2044 = vset.pattern.permute.xlu2 %v2164_v32 }
 0x37f   : > { %v1081_v43 = vadd.f32 %v1080_v42, %v973_v39  ;;  %v1079_v52 = vadd.f32 %v1078_v44, %v1077_v38 }
 0x381   : > { %v1082_v47 = vrot.slane %v1081_v43, 2  ;;  %v1110_v51 = vmul.f32 0.125, %v1079_v52 }
 0x383   : > { %v1083_v48 = vadd.f32 %v1082_v47, %v1081_v43  ;;  %v2429_v53 = vadd.f32 %v2357_v1, %v1110_v51 }
 0x384   : > { %v976_v49 = vpop.f32.mrf.mxu0 }
 0x385   : > { %v1086_v56 = vrot.slane %v976_v49, 4  ;;  %2043 = vset.pattern.permute.xlu1 %v2165_v46  ;;  %1203 = vperm.xlu2 %2044, %v976_v49   ;;  %v1084_v57 = vrot.slane %v1083_v48, 1 }
 0x386   : > { %1399 = vperm.xlu1 %2043, %v2423_v50   ;;  %2046 = vset.pattern.permute.xlu0 %v2164_v32 }
 0x387   : > { %v1087_v55 = vadd.f32 %v1086_v56, %v976_v49  ;;  %v1085_v62 = vadd.f32 %v1084_v57, %v1083_v48  ;;  %v1134_v18 = vpop.permute.xlu0 %1133  ;;  %v2447_v21 = vpop.permute.xlu2 %1359 }
 0x388   : > { %v1211_v27 = vmul.f32 %v1134_v18, %v2458_v25 }
 0x389   : > { %v1088_v58 = vrot.slane %v1087_v55, 2  ;;  %v1111_v32 = vmul.f32 0.125, %v1085_v62 }
 0x38b   : > { %v1089_v59 = vadd.f32 %v1088_v58, %v1087_v55  ;;  %v2437_v11 = vadd.f32 %v2357_v1, %v1111_v32 }
 0x38c   : > { %v978_v60 = vpop.f32.mrf.mxu0 }
 0x38d   : > { %v1090_v63 = vrot.slane %v1089_v59, 1  ;;  %v1092_v0 = vrot.slane %v978_v60, 4  ;;  %2045 = vset.pattern.permute.xlu2 %v2165_v46  ;;  %1208 = vperm.xlu0 %2046, %v978_v60  }
 0x38e   : > { %1403 = vperm.xlu2 %2045, %v2429_v53  }
 0x38f   : > { %v1093_v2 = vadd.f32 %v1092_v0, %v978_v60  ;;  %v1091_v3 = vadd.f32 %v1090_v63, %v1089_v59 }
 0x390   : > { %v1154_v23 = vpop.permute.xlu2 %1153 }
 0x391   : > { %v1094_v4 = vrot.slane %v1093_v2, 2  ;;  %v1112_v5 = vmul.f32 0.125, %v1091_v3  ;;  %v1215_v38 = vmul.f32 %v1154_v23, %v2458_v25 }
 0x393   : > { %v1095_v7 = vadd.f32 %v1094_v4, %v1093_v2  ;;  %v2434_v10 = vadd.f32 %v2357_v1, %v1112_v5  ;;  %v1251_v47 = vrot.slane %v1215_v38, 4 }
 0x395   : > { %v1096_v12 = vrot.slane %v1095_v7, 1  ;;  %1411 = vperm.xlu1 %2043, %v2434_v10   ;;  %2047 = vset.pattern.permute.xlu0 %v2165_v46  ;;  %v1139_v46 = vpop.permute.xlu0 %1138  ;;  %v1252_v51 = vadd.f32 %v1251_v47, %v1215_v38 }
 0x396   : > { %1407 = vperm.xlu0 %2047, %v2437_v11  }
 0x397   : > { %v1097_v13 = vadd.f32 %v1096_v12, %v1095_v7  ;;  %v1144_v14 = vpop.permute.xlu1 %1143  ;;  %v1253_v4 = vrot.slane %v1252_v51, 2 }
 0x398   : > { %v1213_v26 = vmul.f32 %v1144_v14, %v2458_v25  ;;  %v1159_v33 = vpop.permute.xlu2 %1158 }
 0x399   : > { %v1113_v15 = vmul.f32 0.125, %v1097_v13  ;;  %v1216_v42 = vmul.f32 %v1159_v33, %v2458_v25  ;;  %v2478_v33 = vstv %s1963_s25 }
 0x39a   : > { %v1239_v31 = vrot.slane %v1213_v26, 4 }
 0x39b   : > { %v2443_v17 = vadd.f32 %v2357_v1, %v1113_v15 }
 0x39c   : > { %v1240_v41 = vadd.f32 %v1239_v31, %v1213_v26 }
 0x39d   : > { %2049 = vset.pattern.permute.xlu1 %v2166_v20  ;;  %1415 = vperm.xlu2 %2045, %v2443_v17  }
 0x39e   : > { %1541 = vperm.xlu1 %2049, %v2360_v6   ;;  %2048 = vset.pattern.permute.xlu0 %v2166_v20  ;;  %v1212_v6 = vmul.f32 %v1139_v46, %v2458_v25  ;;  %v1241_v49 = vrot.slane %v1240_v41, 2 }
 0x3a0   : > { %v2449_v22 = vpop.permute.xlu1 %1355  ;;  %v1233_v30 = vrot.slane %v1212_v6, 4  ;;  %v1242_v60 = vadd.f32 %v1241_v49, %v1240_v41 }
 0x3a1   : > { %v2473_v63 = vpop.permute.xlu2 %1371 }
 0x3a2   : > { %v1234_v39 = vadd.f32 %v1233_v30, %v1212_v6  ;;  %v1243_v7 = vrot.slane %v1242_v60, 1 }
 0x3a4   : > { %v1235_v48 = vrot.slane %v1234_v39, 2  ;;  %v1244_v23 = vadd.f32 %v1243_v7, %v1242_v60 }
 0x3a5   : > { %2050 = vset.pattern.permute.xlu2 %v2166_v20  ;;  %v1254_v20 = vadd.f32 %v1253_v4, %v1252_v51 }
 0x3a6   : > { %1544 = vperm.xlu2 %2050, %v2369_v16   ;;  %v1236_v59 = vadd.f32 %v1235_v48, %v1234_v39 }
 0x3a7   : > { %v2453_v1 = vpop.permute.xlu0 %1363  ;;  %v1255_v31 = vrot.slane %v1254_v20, 1 }
 0x3a8   : > { %v1420_v39 = vrot.slane %v2453_v1, 6 }
 0x3a9   : > { %v1149_v24 = vpop.permute.xlu1 %1148  ;;  %v1256_v47 = vadd.f32 %v1255_v31, %v1254_v20 }
 0x3aa   : > { %v1214_v16 = vmul.f32 %v1149_v24, %v2458_v25 }
 0x3ac   : > { %v1245_v34 = vrot.slane %v1214_v16, 4 }
 0x3ae   : > { %1550 = vperm.xlu2 %2050, %v2381_v37   ;;  %v1227_v37 = vrot.slane %v1211_v27, 4  ;;  %v1246_v45 = vadd.f32 %v1245_v34, %v1214_v16 }
 0x3af   : > { %v2476_v6 = vpop.permute.xlu2 %1173 }
 0x3b0   : > { %v1228_v44 = vadd.f32 %v1227_v37, %v1211_v27  ;;  %v1247_v55 = vrot.slane %v1246_v45, 2  ;;  %v1417_v37 = vrot.slane %v2447_v21, 7 }
 0x3b2   : > { %v2465_v35 = vpop.permute.xlu1 %1367  ;;  %v1229_v56 = vrot.slane %v1228_v44, 2  ;;  %v1248_v32 = vadd.f32 %v1247_v55, %v1246_v45  ;;  %v1419_v1 = vsel %vm1418_vm1, %v1417_v37, %v2449_v22  ;;  %v1331_v22 = vadd.f32 %v2478_v33, %v1256_v47 }
 0x3b3   : > { %v1423_v21 = vrot.slane %v2465_v35, 5  ;;  %v1422_v55 = vsel %vm1421_vm2, %v1420_v39, %v1419_v1  ;;  %v1219_v37 = vmul.f32 %v2476_v6, %v2458_v25 }
 0x3b4   : > { %v1230_v3 = vadd.f32 %v1229_v56, %v1228_v44  ;;  %v1249_v15 = vrot.slane %v1248_v32, 1 }
 0x3b5   : > { %v1425_v51 = vsel %vm1424_vm3, %v1423_v21, %v1422_v55 }
 0x3b6   : > { %1556 = vperm.xlu2 %2050, %v2393_v61   ;;  %v1257_v61 = vrot.slane %v1216_v42, 4  ;;  %v1231_v14 = vrot.slane %v1230_v3, 1  ;;  %v1250_v16 = vadd.f32 %v1249_v15, %v1248_v32 }
 0x3b7   : > { %v1164_v36 = vpop.permute.xlu0 %1163 }
 0x3b8   : > { %v1217_v43 = vmul.f32 %v1164_v36, %v2458_v25  ;;  %v1258_v62 = vadd.f32 %v1257_v61, %v1216_v42  ;;  %v1232_v27 = vadd.f32 %v1231_v14, %v1230_v3  ;;  %v1329_v36 = vadd.f32 %v2478_v33, %v1244_v23  ;;  %v382_v61 = vld [vmem:[%s2487_s11] sm:$0xff] }
 0x3b9   : > { %v1330_v42 = vadd.f32 %v2478_v33, %v1250_v16  ;;  %vm1347_vm6 = vcmp.gt.f32.partialorder %v382_v61, 0.5 }
 0x3ba   : > { %v1263_v52 = vrot.slane %v1217_v43, 4  ;;  %v1259_v12 = vrot.slane %v1258_v62, 2  ;;  %v1327_v45 = vadd.f32 %v2478_v33, %v1232_v27 }
 0x3bc   : > { %v1264_v0 = vadd.f32 %v1263_v52, %v1217_v43  ;;  %v1260_v24 = vadd.f32 %v1259_v12, %v1258_v62  ;;  %v1426_v62 = vrot.slane %v2473_v63, 4 }
 0x3be   : > { %1568 = vperm.xlu2 %2050, %v2417_v40   ;;  %v1237_v40 = vrot.slane %v1236_v59, 1  ;;  %v1265_v13 = vrot.slane %v1264_v0, 2  ;;  %v1261_v38 = vrot.slane %v1260_v24, 1  ;;  %v1428_v32 = vsel %vm1427_vm4, %v1426_v62, %v1425_v51 }
 0x3bf   : > { %v1169_v57 = vpop.permute.xlu1 %1168 }
 0x3c0   : > { %v1218_v58 = vmul.f32 %v1169_v57, %v2458_v25  ;;  %v1238_v46 = vadd.f32 %v1237_v40, %v1236_v59  ;;  %v1266_v26 = vadd.f32 %v1265_v13, %v1264_v0  ;;  %v1262_v56 = vadd.f32 %v1261_v38, %v1260_v24  ;;  %v1380_v0 = vpop.permute.xlu2 %1379 }
 0x3c1   : > { %v1432_v63 = vrot.slane %v1380_v0, 2 }
 0x3c2   : > { %v1269_v2 = vrot.slane %v1218_v58, 4  ;;  %v1328_v34 = vadd.f32 %v2478_v33, %v1238_v46  ;;  %v1267_v41 = vrot.slane %v1266_v26, 1 }
 0x3c4   : > { %v1270_v5 = vadd.f32 %v1269_v2, %v1218_v58  ;;  %v1470_v52 = vsel %vm1418_vm1, %v1328_v34, %v1327_v45  ;;  %v1268_v35 = vadd.f32 %v1267_v41, %v1266_v26  ;;  %v1332_v2 = vadd.f32 %v2478_v33, %v1262_v56 }
 0x3c5   : > { %v1471_v57 = vsel %vm1421_vm2, %v1329_v36, %v1470_v52  ;;  %v1275_v41 = vrot.slane %v1219_v37, 4 }
 0x3c6   : > { %1574 = vperm.xlu2 %2050, %v2429_v53   ;;  %v1271_v18 = vrot.slane %v1270_v5, 2  ;;  %v1343_v53 = vlaneseq  ;;  %v1472_v60 = vsel %vm1424_vm3, %v1330_v42, %v1471_v57  ;;  %v1333_v3 = vadd.f32 %v2478_v33, %v1268_v35 }
 0x3c7   : > { %v1473_v4 = vsel %vm1427_vm4, %v1331_v22, %v1472_v60 }
 0x3c8   : > { %v1272_v30 = vadd.f32 %v1271_v18, %v1270_v5  ;;  %v1376_v48 = vpop.permute.xlu1 %1375  ;;  %v2492_v49 = vand.u32 127, %v1343_v53  ;;  %v1474_v13 = vsel %vm1430_vm7, %v1332_v2, %v1473_v4  ;;  %v1189_v23 = vpop.permute.xlu2 %1188 }
 0x3c9   : > { %v1429_v59 = vrot.slane %v1376_v48, 3  ;;  %v1475_v18 = vsel %vm1433_vm10, %v1333_v3, %v1474_v13  ;;  %v1222_v42 = vmul.f32 %v1189_v23, %v2458_v25  ;;  %v1276_v48 = vadd.f32 %v1275_v41, %v1219_v37 }
 0x3ca   : > { %v1273_v43 = vrot.slane %v1272_v30, 1  ;;  %vm1345_vm5 = vcmp.lt.s32.totalorder %v2492_v49, 8  ;;  %vm1346_vm8 = vcmp.eq.s32.totalorder %v2492_v49, 8 }
 0x3cb   : > { %v1431_v5 = vsel %vm1430_vm7, %v1429_v59, %v1428_v32  ;;  %vm1349_vm9 = vmand %vm1345_vm5, %vm1347_vm6  ;;  %v1293_v1 = vrot.slane %v1222_v42, 4  ;;  %v1277_v57 = vrot.slane %v1276_v48, 2 }
 0x3cc   : > { %v1274_v58 = vadd.f32 %v1273_v43, %v1272_v30  ;;  %vm2517_vm12 = vmor %vm1349_vm9, %vm1346_vm8  ;;  %v1434_v15 = vsel %vm1433_vm10, %v1432_v63, %v1431_v5  ;;  %vm1536_vm9 = vcmp.eq.s32.totalorder %v2492_v49, 9 }
 0x3cd   : > { %v1294_v51 = vadd.f32 %v1293_v1, %v1222_v42  ;;  %v1278_v2 = vadd.f32 %v1277_v57, %v1276_v48 }
 0x3ce   : > { %v1334_v40 = vadd.f32 %v2478_v33, %v1274_v58 }
 0x3cf   : > { %v1179_v44 = vpop.permute.xlu0 %1178  ;;  %v1295_v3 = vrot.slane %v1294_v51, 2 }
 0x3d0   : > { %v1476_v46 = vsel %vm1436_vm11, %v1334_v40, %v1475_v18  ;;  %v1220_v16 = vmul.f32 %v1179_v44, %v2458_v25  ;;  %v2533_v30 = vpop.permute.xlu2 %1391 }
 0x3d2   : > { %v1281_v36 = vrot.slane %v1220_v16, 4 }
 0x3d4   : > { %v1282_v21 = vadd.f32 %v1281_v36, %v1220_v16 }
 0x3d6   : > { %v1283_v6 = vrot.slane %v1282_v21, 2 }
 0x3d7   : > { %v1184_v26 = vpop.permute.xlu1 %1183 }
 0x3d8   : > { %v1384_v7 = vpop.permute.xlu0 %1383  ;;  %v1221_v31 = vmul.f32 %v1184_v26, %v2458_v25  ;;  %v1284_v60 = vadd.f32 %v1283_v6, %v1282_v21 }
 0x3d9   : > { %v1435_v12 = vrot.slane %v1384_v7, 1  ;;  %v1296_v7 = vadd.f32 %v1295_v3, %v1294_v51 }
 0x3da   : > { %v1287_v38 = vrot.slane %v1221_v31, 4  ;;  %v1285_v5 = vrot.slane %v1284_v60, 1 }
 0x3db   : > { %v1437_v20 = vsel %vm1436_vm11, %v1435_v12, %v1434_v15 }
 0x3dc   : > { %v1486_v24 = vsel %vm1346_vm8, %v1437_v20, %v1476_v46  ;;  %v1288_v44 = vadd.f32 %v1287_v38, %v1221_v31  ;;  %v1286_v15 = vadd.f32 %v1285_v5, %v1284_v60  ;;  %v1438_v38 = vrot.slane %v2533_v30, 7  ;;  %v383_v30 = vld [vmem:[%s2487_s11 + $0x8] sm:$0xff] }
 0x3dd   : > { %v2529_v27 = vsel %vm2517_vm12, %v1486_v24, -1e+30  ;;  %v1297_v24 = vrot.slane %v1296_v7, 1  ;;  %vm1348_vm13 = vcmp.gt.f32.partialorder %v383_v30, 0.5 }
 0x3de   : > { %1490 = vmax.xlane.f32.xlu0 %v2529_v27  ;;  %v1289_v55 = vrot.slane %v1288_v44, 2  ;;  %vm1350_vm14 = vmand %vm1345_vm5, %vm1348_vm13 }
 0x3df   : > { %v1204_v43 = vpop.permute.xlu2 %1203  ;;  %vm2575_vm15 = vmor %vm1350_vm14, %vm1346_vm8 }
 0x3e0   : > { %v2536_v53 = vpop.permute.xlu1 %1387  ;;  %v1225_v52 = vmul.f32 %v1204_v43, %v2458_v25  ;;  %v1290_v62 = vadd.f32 %v1289_v55, %v1288_v44  ;;  %v1298_v44 = vadd.f32 %v1297_v24, %v1296_v7 }
 0x3e1   : > { %v1439_v48 = vsel %vm1418_vm1, %v1438_v38, %v2536_v53 }
 0x3e2   : > { %v1311_v59 = vrot.slane %v1225_v52, 4  ;;  %v1291_v40 = vrot.slane %v1290_v62, 1  ;;  %v1338_v55 = vadd.f32 %v2478_v33, %v1298_v44 }
 0x3e4   : > { %v1312_v4 = vadd.f32 %v1311_v59, %v1225_v52  ;;  %v1292_v18 = vadd.f32 %v1291_v40, %v1290_v62 }
 0x3e6   : > { %v1313_v13 = vrot.slane %v1312_v4, 2 }
 0x3e7   : > { %v1194_v34 = vpop.permute.xlu0 %1193 }
 0x3e8   : > { %v1223_v39 = vmul.f32 %v1194_v34, %v2458_v25  ;;  %v1314_v37 = vadd.f32 %v1313_v13, %v1312_v4  ;;  %v1336_v34 = vadd.f32 %v2478_v33, %v1286_v15  ;;  %v1404_v42 = vpop.permute.xlu2 %1403 }
 0x3ea   : > { %v1299_v45 = vrot.slane %v1223_v39, 4 }
 0x3ec   : > { %v1300_v35 = vadd.f32 %v1299_v45, %v1223_v39  ;;  %v1337_v39 = vadd.f32 %v2478_v33, %v1292_v18 }
 0x3ee   : > { %v1301_v0 = vrot.slane %v1300_v35, 2 }
 0x3ef   : > { %v1199_v47 = vpop.permute.xlu1 %1198 }
 0x3f0   : > { %v1224_v61 = vmul.f32 %v1199_v47, %v2458_v25  ;;  %v1396_v22 = vpop.permute.xlu0 %1395  ;;  %v1302_v63 = vadd.f32 %v1301_v0, %v1300_v35  ;;  %v1315_v47 = vrot.slane %v1314_v37, 1  ;;  %v1444_v35 = vrot.slane %v1404_v42, 4 }
 0x3f2   : > { %v1305_v56 = vrot.slane %v1224_v61, 4  ;;  %1538 = vperm.xlu0 %2048, %v2363_v8   ;;  %v1279_v8 = vrot.slane %v1278_v2, 1  ;;  %v1303_v20 = vrot.slane %v1302_v63, 1  ;;  %v1316_v59 = vadd.f32 %v1315_v47, %v1314_v37 }
 0x3f4   : > { %v1306_v58 = vadd.f32 %v1305_v56, %v1224_v61  ;;  %v1280_v23 = vadd.f32 %v1279_v8, %v1278_v2  ;;  %v1304_v41 = vadd.f32 %v1303_v20, %v1302_v63  ;;  %v1341_v63 = vadd.f32 %v2478_v33, %v1316_v59 }
 0x3f6   : > { %v1307_v32 = vrot.slane %v1306_v58, 2  ;;  %v1335_v43 = vadd.f32 %v2478_v33, %v1280_v23  ;;  %v1339_v6 = vadd.f32 %v2478_v33, %v1304_v41 }
 0x3f7   : > { %v1416_v2 = vpop.permute.xlu2 %1415 }
 0x3f8   : > { %v1308_v12 = vadd.f32 %v1307_v32, %v1306_v58  ;;  %v1400_v16 = vpop.permute.xlu1 %1399  ;;  %v1477_v1 = vsel %vm1418_vm1, %v1336_v34, %v1335_v43  ;;  %v1450_v7 = vrot.slane %v1416_v2, 1 }
 0x3f9   : > { %v1442_v21 = vrot.slane %v1400_v16, 5  ;;  %v1478_v52 = vsel %vm1421_vm2, %v1337_v39, %v1477_v1 }
 0x3fa   : > { %1559 = vperm.xlu0 %2048, %v2399_v9   ;;  %v1309_v26 = vrot.slane %v1308_v12, 1  ;;  %v1440_v9 = vrot.slane %v1396_v22, 6  ;;  %v1479_v22 = vsel %vm1424_vm3, %v1338_v55, %v1478_v52 }
 0x3fb   : > { %v1480_v4 = vsel %vm1427_vm4, %v1339_v6, %v1479_v22 }
 0x3fc   : > { %v1310_v45 = vadd.f32 %v1309_v26, %v1308_v12 }
 0x3fe   : > { %v1340_v57 = vadd.f32 %v2478_v33, %v1310_v45 }
 0x3ff   : > { %v1209_v46 = vpop.permute.xlu0 %1208 }
 0x400   : > { %v1226_v31 = vmul.f32 %v1209_v46, %v2458_v25  ;;  %v1481_v40 = vsel %vm1430_vm7, %v1340_v57, %v1480_v4 }
 0x401   : > { %v1482_v13 = vsel %vm1433_vm10, %v1341_v63, %v1481_v40 }
 0x402   : > { %v1317_v36 = vrot.slane %v1226_v31, 4  ;;  %1562 = vperm.xlu0 %2048, %v2405_v19   ;;  %v1441_v19 = vsel %vm1421_vm2, %v1440_v9, %v1439_v48 }
 0x403   : > { %v1443_v56 = vsel %vm1424_vm3, %v1442_v21, %v1441_v19 }
 0x404   : > { %v1318_v25 = vadd.f32 %v1317_v36, %v1226_v31  ;;  %v1445_v0 = vsel %vm1427_vm4, %v1444_v35, %v1443_v56 }
 0x406   : > { %v1319_v61 = vrot.slane %v1318_v25, 2 }
 0x407   : > { %v1412_v58 = vpop.permute.xlu1 %1411 }
 0x408   : > { %v1320_v51 = vadd.f32 %v1319_v61, %v1318_v25  ;;  %v1408_v53 = vpop.permute.xlu0 %1407  ;;  %v1448_v3 = vrot.slane %v1412_v58, 2 }
 0x409   : > { %v1446_v60 = vrot.slane %v1408_v53, 3 }
 0x40a   : > { %v1321_v62 = vrot.slane %v1320_v51, 1  ;;  %1577 = vperm.xlu0 %2048, %v2437_v11  }
 0x40b   : > { %v1447_v32 = vsel %vm1430_vm7, %v1446_v60, %v1445_v0 }
 0x40c   : > { %v1322_v5 = vadd.f32 %v1321_v62, %v1320_v51  ;;  %v1449_v8 = vsel %vm1433_vm10, %v1448_v3, %v1447_v32 }
 0x40d   : > { %v1451_v15 = vsel %vm1436_vm11, %v1450_v7, %v1449_v8 }
 0x40e   : > { %v1342_v11 = vadd.f32 %v2478_v33, %v1322_v5 }
 0x410   : > { %v1483_v18 = vsel %vm1436_vm11, %v1342_v11, %v1482_v13  ;;  %v1542_v31 = vpop.permute.xlu1 %1541 }
 0x411   : > { %v1487_v20 = vsel %vm1346_vm8, %v1451_v15, %v1483_v18  ;;  %v1585_v41 = vrot.slane %v1542_v31, 7 }
 0x412   : > { %v1489_v46 = vsel %vm2575_vm15, %v1487_v20, -1e+30 }
 0x413   : > { %1492 = vmax.xlane.f32.xlu1 %v1489_v46 }
 0x42c   : > { %1547 = vperm.xlu1 %2049, %v2376_v28  }
 0x434   : > { %1553 = vperm.xlu1 %2049, %v2388_v54  }
 0x43c   : > { %1565 = vperm.xlu1 %2049, %v2411_v29  }
 0x444   : > { %1571 = vperm.xlu1 %2049, %v2423_v50  }
 0x44c   : > { %1580 = vperm.xlu1 %2049, %v2434_v10   ;;  %v1545_v10 = vpop.permute.xlu2 %1544 }
 0x44d   : > { %v1587_v43 = vrot.slane %v1545_v10, 6 }
 0x451   : > { %v1491_v33 = vpop.xlane.xlu0 %1490 }
 0x452   : > { %v1494_v23 = vsub.f32 %v2529_v27, %v1491_v33 }
 0x454   : > { %v1496_v24 = vmul.f32 1.442695, %v1494_v23  ;;  %v1551_v27 = vpop.permute.xlu2 %1550 }
 0x455   : > { %v1591_v1 = vrot.slane %v1551_v27, 4 }
 0x456   : > { %2055 = vpow2.f32 %v1496_v24 }
 0x45c   : > { %v2056_v26 = vpop.eup %2055  ;;  %v1557_v34 = vpop.permute.xlu2 %1556 }
 0x45d   : > { %v1500_v16 = vsel %vm2517_vm12, %v2056_v26, 0.0  ;;  %v1595_v55 = vrot.slane %v1557_v34, 2 }
 0x45e   : > { %1502 = vadd.xlane.f32.xlu2 %v1500_v16 }
 0x464   : > { %v1569_v14 = vpop.permute.xlu2 %1568  ;;  %v1539_v39 = vpop.permute.xlu0 %1538 }
 0x465   : > { %v1586_v42 = vsel %vm1418_vm1, %v1585_v41, %v1539_v39  ;;  %v1601_v7 = vrot.slane %v1569_v14, 6 }
 0x466   : > { %v1588_v25 = vsel %vm1421_vm2, %v1587_v43, %v1586_v42 }
 0x46c   : > { %v2600_v9 = vpop.permute.xlu2 %1574  ;;  %v1560_v35 = vpop.permute.xlu0 %1559 }
 0x46d   : > { %v1597_v59 = vrot.slane %v1560_v35, 1 }
 0x474   : > { %v1563_v4 = vpop.permute.xlu0 %1562 }
 0x47c   : > { %v1578_v33 = vpop.permute.xlu0 %1577 }
 0x486   : > { %v1493_v28 = vpop.xlane.xlu1 %1492 }
 0x487   : > { %v1495_v37 = vsub.f32 %v1489_v46, %v1493_v28  ;;  %v1605_v46 = vrot.slane %v2600_v9, 4 }
 0x489   : > { %v1498_v54 = vmul.f32 1.442695, %v1495_v37  ;;  %v1607_v37 = vrot.slane %v1578_v33, 3 }
 0x48b   : > { %2057 = vpow2.f32 %v1498_v54 }
 0x491   : > { %v2058_v29 = vpop.eup %2057 }
 0x492   : > { %v2596_v50 = vsel %vm2575_vm15, %v2058_v29, 0.0 }
 0x493   : > { %1504 = vadd.xlane.f32.xlu2 %v2596_v50 }
 0x49e   : > { %v1548_v36 = vpop.permute.xlu1 %1547 }
 0x49f   : > { %v1589_v21 = vrot.slane %v1548_v36, 5 }
 0x4a6   : > { %v1554_v44 = vpop.permute.xlu1 %1553 }
 0x4a7   : > { %v1593_v48 = vrot.slane %v1554_v44, 3 }
 0x4ab   : > { %1583 = vperm.xlu2 %2050, %v2443_v17   ;;  %v1590_v17 = vsel %vm1424_vm3, %v1589_v21, %v1588_v25 }
 0x4ac   : > { %v1592_v30 = vsel %vm1427_vm4, %v1591_v1, %v1590_v17 }
 0x4ad   : > { %v1594_v56 = vsel %vm1430_vm7, %v1593_v48, %v1592_v30 }
 0x4ae   : > { %v1596_v58 = vsel %vm1433_vm10, %v1595_v55, %v1594_v56  ;;  %v1566_v2 = vpop.permute.xlu1 %1565 }
 0x4af   : > { %v1598_v0 = vsel %vm1436_vm11, %v1597_v59, %v1596_v58  ;;  %v1599_v5 = vrot.slane %v1566_v2, 7 }
 0x4b1   : > { %v1600_v63 = vsel %vm1418_vm1, %v1599_v5, %v1563_v4 }
 0x4b2   : > { %v1602_v12 = vsel %vm1421_vm2, %v1601_v7, %v1600_v63 }
 0x4b6   : > { %v1572_v32 = vpop.permute.xlu1 %1571 }
 0x4b7   : > { %v1603_v8 = vrot.slane %v1572_v32, 5 }
 0x4b9   : > { %v1604_v15 = vsel %vm1424_vm3, %v1603_v8, %v1602_v12 }
 0x4be   : > { %v1581_v18 = vpop.permute.xlu1 %1580 }
 0x4bf   : > { %v1609_v31 = vrot.slane %v1581_v18, 2 }
 0x4d1   : > { %v1503_v38 = vpop.xlane.xlu2 %1502 }
 0x4d2   : > { %2059 = vrcp.f32 %v1503_v38  ;;  %v1517_v61 = vand.u32 2147483648, %v1503_v38  ;;  %v1515_v6 = vand.u32 2147483647, %v1503_v38  ;;  %vm1511_vm5 = vweird.f32 %v1503_v38 }
 0x4d4   : > { %v1518_v51 = vor.u32 1.1754944e-38, %v1517_v61  ;;  %vm1516_vm8 = vcmp.eq.f32.partialorder %v1515_v6, 8.507059e+37 }
 0x4d8   : > { %v2060_v45 = vpop.eup %2059 }
 0x4d9   : > { %v1507_v47 = vmul.f32 %v2060_v45, %v1503_v38  ;;  %vm1512_vm0 = vweird.f32 %v2060_v45 }
 0x4da   : > { %vm1513_vm6 = vmor %vm1511_vm5, %vm1512_vm0 }
 0x4db   : > { %v1508_v19 = vsub.f32 1.0, %v1507_v47 }
 0x4dd   : > { %v1509_v52 = vmul.f32 %v2060_v45, %v1508_v19 }
 0x4df   : > { %v1510_v57 = vadd.f32 %v2060_v45, %v1509_v52 }
 0x4e1   : > { %v1514_v53 = vsel %vm1513_vm6, %v2060_v45, %v1510_v57 }
 0x4e2   : > { %v1519_v60 = vsel %vm1516_vm8, %v1518_v51, %v1514_v53 }
 0x4e3   : > { %v1534_v62 = vmul.f32 %v1519_v60, %v1500_v16  ;;  %v1606_v16 = vsel %vm1427_vm4, %v1605_v46, %v1604_v15 }
 0x4e4   : > { %v1608_v27 = vsel %vm1430_vm7, %v1607_v37, %v1606_v16 }
 0x4e5   : > { %v1615_v22 = vsel %vm1536_vm9, %v1598_v0, %v1534_v62  ;;  %v1610_v14 = vsel %vm1433_vm10, %v1609_v31, %v1608_v27 }
 0x4e6   : > { %1617 = vst [vmem:[%s2615_s14] sm:$0xff] %v1615_v22 }
 0x506   : > { %v1505_v3 = vpop.xlane.xlu2 %1504 }
 0x507   : > { %2061 = vrcp.f32 %v1505_v3  ;;  %v1531_v20 = vand.u32 2147483648, %v1505_v3  ;;  %v1529_v24 = vand.u32 2147483647, %v1505_v3  ;;  %vm1525_vm1 = vweird.f32 %v1505_v3 }
 0x509   : > { %v1532_v54 = vor.u32 1.1754944e-38, %v1531_v20  ;;  %vm1530_vm3 = vcmp.eq.f32.partialorder %v1529_v24, 8.507059e+37 }
 0x50d   : > { %v2062_v40 = vpop.eup %2061 }
 0x50e   : > { %v1521_v11 = vmul.f32 %v2062_v40, %v1505_v3  ;;  %vm1526_vm12 = vweird.f32 %v2062_v40  ;;  %v1584_v26 = vpop.permute.xlu2 %1583 }
 0x50f   : > { %vm1527_vm2 = vmor %vm1525_vm1, %vm1526_vm12  ;;  %v1611_v29 = vrot.slane %v1584_v26, 1 }
 0x510   : > { %v1522_v13 = vsub.f32 1.0, %v1521_v11 }
 0x511   : > { %v1612_v36 = vsel %vm1436_vm11, %v1611_v29, %v1610_v14 }
 0x512   : > { %v1523_v23 = vmul.f32 %v2062_v40, %v1522_v13 }
 0x514   : > { %v1524_v28 = vadd.f32 %v2062_v40, %v1523_v23 }
 0x516   : > { %v1528_v10 = vsel %vm1527_vm2, %v2062_v40, %v1524_v28 }
 0x517   : > { %v1533_v34 = vsel %vm1530_vm3, %v1532_v54, %v1528_v10 }
 0x518   : > { %v1535_v9 = vmul.f32 %v1533_v34, %v2596_v50 }
 0x51a   : > { %v1616_v38 = vsel %vm1536_vm9, %v1612_v36, %v1535_v9 }
 0x51b   : > { %1618 = vst [vmem:[%s2615_s14 + $0x8] sm:$0xff] %v1616_v38 }
 0x51c   : > { %2120 = shalt.err (!%p2117_p9)
}
 0x51d   : > { %s2167_s12 = smov 128   ;;  %s2168_s13 = smov 8  }
 0x51e   : > { %1968 = dma.vmem_to_hbm [thread:$0]  (%p2242_p5), %s1633_s19, 256, %s1635_s20, %s1620_s16, %s2167_s12, %s2167_s12, %s2168_s13  }
 0x51f PF: > { %p1980_p10 = scmp.ge.s32.totalorder %s2159_s24, 2  ;;  %s1649_s14 = sand.u32 1, %s2147_s21  }
 0x520   : > { %s1650_s15 = scalar_lea.sflag [#allocation4], %s1649_s14 }
 0x521   : > { %p1975_p11 = pnand %p1980_p10, %p2246_p6 }
 0x523   : > { %p1976_p12 = pneg %p1975_p11 }
 0x525   : > { %2142 = dma.done.wait (%p1976_p12), %s1650_s15, 256  }
 0x526   : > { %2144 = vsyncadd (%p1976_p12), %s1650_s15, 4294967040  ;;  %p17_p13 = scmp.ge.s32.totalorder %s2229_s27, 4   ;;  %s2680_s21 = smov %s2151_s22 }
 0x527   : > { %s2681_s22 = smov %s2155_s23  ;;  %s2682_s23 = smov %s2240_s30 }
 0x528   : > { %s2683_s24 = smov %s2229_s27  ;;  %19 = sbr.rel (!%p17_p13) target bundleno = 4 (0x4), region = 87 }
 0x52d   :  { %1656 = vsyncpa [#allocation3], 1 }
 0x52e   :  { %1658 = vsyncpa [#allocation3 + $0x1], 1 }
 0x52f   :  { %1659 = vsyncpa [#allocation4], 1 }
 0x530   :  { %1661 = vsyncpa [#allocation4 + $0x1], 1 }

</bundles_post_ra>
